<compile_context>
chip_gen: v7x
topology: tpu7x:2x2x1
jax: 0.10.0
libtpu: 0.0.40
codegen_flags: <defaults>
</compile_context>

<pallas_src>
import functools

import jax
import jax.numpy as jnp
from jax import lax
from jax.experimental import pallas as pl
from jax.experimental.pallas import tpu as pltpu


_VMEM_LIMIT = 48 * 1024 * 1024  # explicit scoped-VMEM cap (< v7x 64 MiB physical)


def _round_up(x, m):
    return (x + m - 1) // m * m


# ----------------------------------------------------------------------------
# Pallas kernels
# ----------------------------------------------------------------------------
def _matmul_kernel(apply_relu, patches_ref, w_ref, y_ref):
    """first layer: y = relu(patches @ w); last layer: y = patches @ w."""
    acc = jnp.dot(patches_ref[...], w_ref[...], preferred_element_type=jnp.float32)
    if apply_relu:
        acc = jnp.maximum(acc, 0.0)
    y_ref[...] = acc.astype(y_ref.dtype)


def _mid_layer_kernel(m_true, tile_m, patches_ref, w_ref, gamma_ref,
                      y_ref, sd_ref, sum_ref, sumsq_ref):
    """mid layer: z = patches @ w ; sd = sqrt(var_channel(z) + 1e-5)
                 y = relu(z / sd * gamma);  sd is emitted for running_sd."""
    i = pl.program_id(0)
    n_tiles = pl.num_programs(0)

    @pl.when(i == 0)
    def _():
        sum_ref[...] = jnp.zeros_like(sum_ref)
        sumsq_ref[...] = jnp.zeros_like(sumsq_ref)

    acc = jnp.dot(patches_ref[...], w_ref[...], preferred_element_type=jnp.float32)

    # per-tile partial reductions for the channel-wise variance (overlaps MXU work)
    sum_ref[...] += jnp.sum(acc, axis=0, keepdims=True)
    sumsq_ref[...] += jnp.sum(acc * acc, axis=0, keepdims=True)

    # stash the un-normalized conv output into the VMEM-resident output block
    row0 = pl.multiple_of(i * tile_m, tile_m)
    y_ref[pl.ds(row0, tile_m), :] = acc.astype(y_ref.dtype)

    @pl.when(i == n_tiles - 1)
    def _():
        inv_m = 1.0 / m_true                      # padded rows are zero -> no bias
        mean = sum_ref[...] * inv_m
        var = sumsq_ref[...] * inv_m - mean * mean
        sd_ref[...] = jnp.sqrt(var + 1e-5)
        scale = lax.rsqrt(var + 1e-5) * gamma_ref[...]   # (1, Cout) f32, EUP rsqrt

        # TODO(synk): the whole (M, C) conv output is kept resident in VMEM for
        # this finalize pass; for very large images switch to a two-pass scheme.
        def body(t, carry):
            r0 = pl.multiple_of(t * tile_m, tile_m)
            blk = y_ref[pl.ds(r0, tile_m), :].astype(jnp.float32)
            y_ref[pl.ds(r0, tile_m), :] = jnp.maximum(blk * scale, 0.0).astype(y_ref.dtype)
            return carry

        lax.fori_loop(0, n_tiles, body, 0)


# ----------------------------------------------------------------------------
# pallas_call wrappers
# ----------------------------------------------------------------------------
def _conv_matmul(patches, w, *, tile_m, apply_relu, out_dtype):
    m_p, k = patches.shape
    cout = w.shape[1]
    grid = (m_p // tile_m,)
    return pl.pallas_call(
        functools.partial(_matmul_kernel, apply_relu),
        grid=grid,
        in_specs=[
            pl.BlockSpec((tile_m, k), lambda i: (i, 0)),
            pl.BlockSpec((k, cout), lambda i: (0, 0)),     # resident weights
        ],
        out_specs=pl.BlockSpec((tile_m, cout), lambda i: (i, 0)),
        out_shape=jax.ShapeDtypeStruct((m_p, cout), out_dtype),
        compiler_params=pltpu.CompilerParams(
            dimension_semantics=("parallel",),             # megacore on v7x
            vmem_limit_bytes=_VMEM_LIMIT),
    )(patches, w)


def _conv_mid(patches, w, gamma, m_true, tile_m):
    m_p, k = patches.shape
    cout = w.shape[1]
    grid = (m_p // tile_m,)
    return pl.pallas_call(
        functools.partial(_mid_layer_kernel, m_true, tile_m),
        grid=grid,
        in_specs=[
            pl.BlockSpec((tile_m, k), lambda i: (i, 0)),
            pl.BlockSpec((k, cout), lambda i: (0, 0)),
            pl.BlockSpec((1, cout), lambda i: (0, 0)),
        ],
        out_specs=(
            pl.BlockSpec((m_p, cout), lambda i: (0, 0)),   # resident across M tiles
            pl.BlockSpec((1, cout), lambda i: (0, 0)),
        ),
        out_shape=(
            jax.ShapeDtypeStruct((m_p, cout), jnp.bfloat16),
            jax.ShapeDtypeStruct((1, cout), jnp.float32),
        ),
        scratch_shapes=[
            pltpu.VMEM((1, cout), jnp.float32),            # sum
            pltpu.VMEM((1, cout), jnp.float32),            # sum of squares
        ],
        compiler_params=pltpu.CompilerParams(
            dimension_semantics=("arbitrary",),            # cross-tile reduction state
            vmem_limit_bytes=_VMEM_LIMIT),
    )(patches, w, gamma)


# ----------------------------------------------------------------------------
# Glue: im2col, weight re-layout
# ----------------------------------------------------------------------------
def _im2col(x_nhwc, tile_m, k_pad):
    """(N,H,W,C) bf16 -> zero-padded (M_p, k_pad) bf16 patches, M = N*H*W."""
    n, h, w, c = x_nhwc.shape
    xp = jnp.pad(x_nhwc, ((0, 0), (1, 1), (1, 1), (0, 0)))    # conv padding=1
    m = n * h * w
    taps = [xp[:, dy:dy + h, dx:dx + w, :].reshape(m, c)
            for dy in range(3) for dx in range(3)]
    patches = jnp.concatenate(taps, axis=1)                    # (M, 9*C)
    m_p = _round_up(m, tile_m)
    # TODO(synk): this still materializes the 9-tap im2col in HBM (~9x activation
    # reads per layer); removing it requires halo-windowed input blocks
    # (pl.Element / manual DMA) with in-kernel patch assembly.
    return jnp.pad(patches, ((0, m_p - m), (0, k_pad - 9 * c)))


def _to_matmul_weights(w_oihw, k_pad, cout_pad):
    """torch Conv2d weight (Cout,Cin,3,3) -> zero-padded (k_pad, cout_pad) bf16."""
    cout, cin, kh, kw = w_oihw.shape
    wm = jnp.transpose(w_oihw, (2, 3, 1, 0)).reshape(kh * kw * cin, cout)
    wm = jnp.pad(wm, ((0, k_pad - kh * kw * cin), (0, cout_pad - cout)))
    return wm.astype(jnp.bfloat16)


def bfcnn_forward(x_nchw, weights, gammas, running_sd, *, tile_m=512):
    """Training-mode forward of BFCNN (the module's default .training state)."""
    assert tile_m % 128 == 0
    num_layers = len(weights)
    n, c_in, h, w = x_nchw.shape
    num_kernels = weights[0].shape[0]
    m = n * h * w

    a = jnp.transpose(x_nchw, (0, 2, 3, 1)).astype(jnp.bfloat16)   # NHWC bf16

    # ---- first layer: relu(conv) ----
    k_pad = max(128, _round_up(9 * c_in, 8))
    patches = _im2col(a, tile_m, k_pad)
    w0 = _to_matmul_weights(weights[0], k_pad, num_kernels)
    a = _conv_matmul(patches, w0, tile_m=tile_m, apply_relu=True,
                     out_dtype=jnp.bfloat16)
    a = a[:m].reshape(n, h, w, num_kernels)

    # ---- mid layers: relu(conv / sd * gamma), emit sd ----
    k_pad = max(128, _round_up(9 * num_kernels, 8))
    new_running_sd = []
    for l in range(1, num_layers - 1):
        patches = _im2col(a, tile_m, k_pad)
        wl = _to_matmul_weights(weights[l], k_pad, num_kernels)
        gamma = gammas[l - 1].reshape(1, num_kernels).astype(jnp.float32)
        y, sd = _conv_mid(patches, wl, gamma, m, tile_m)
        a = y[:m].reshape(n, h, w, num_kernels)
        # TODO(synk): PyTorch mutates the running_sd Parameter in place; the
        # updated buffer is returned functionally instead.
        new_running_sd.append(
            0.9 * running_sd[l - 1] + 0.1 * sd.reshape(1, num_kernels, 1, 1))

    # ---- last layer: plain conv (Cout=1 padded to 128 lanes in-kernel) ----
    cout = weights[-1].shape[0]
    cout_pad = max(128, _round_up(cout, 8))
    patches = _im2col(a, tile_m, k_pad)
    wl = _to_matmul_weights(weights[-1], k_pad, cout_pad)
    y = _conv_matmul(patches, wl, tile_m=tile_m, apply_relu=False,
                     out_dtype=jnp.float32)
    y = y[:m, :cout].reshape(n, h, w, cout)
    return jnp.transpose(y, (0, 3, 1, 2)), new_running_sd


# ----------------------------------------------------------------------------
# Pure-JAX f32 reference for validation
# ----------------------------------------------------------------------------
def _ref_forward(x, weights, gammas):
    dn = ("NCHW", "OIHW", "NCHW")

    def conv(a, wt):
        return jax.lax.conv_general_dilated(
            a, wt, (1, 1), ((1, 1), (1, 1)),
            dimension_numbers=dn, precision=jax.lax.Precision.HIGHEST)

    num_layers = len(weights)
    a = jax.nn.relu(conv(x, weights[0]))
    sds = []
    for l in range(1, num_layers - 1):
        a = conv(a, weights[l])
        sd = jnp.sqrt(jnp.var(a, axis=(0, 2, 3), keepdims=True) + 1e-5)
        sds.append(sd)
        a = jax.nn.relu(a / sd * gammas[l - 1])
    return conv(a, weights[-1]), sds


if __name__ == "__main__":
    NUM_LAYERS = 6        # structurally identical to the module (default is 20)
    NUM_KERNELS = 64
    NUM_CHANNELS = 1
    N, H, W = 2, 16, 16
    TILE_M = 128          # M = 512 -> 4 tiles; exercises the multi-tile paths

    key = jax.random.PRNGKey(0)
    keys = jax.random.split(key, NUM_LAYERS + (NUM_LAYERS - 2) + 1)

    weights = [jax.random.normal(keys[0], (NUM_KERNELS, NUM_CHANNELS, 3, 3),
                                 jnp.float32) * 0.1]
    for l in range(1, NUM_LAYERS - 1):
        weights.append(jax.random.normal(keys[l], (NUM_KERNELS, NUM_KERNELS, 3, 3),
                                         jnp.float32) * (1.0 / 24.0))
    weights.append(jax.random.normal(keys[NUM_LAYERS - 1],
                                     (NUM_CHANNELS, NUM_KERNELS, 3, 3),
                                     jnp.float32) * 0.05)

    gammas = []
    for i in range(NUM_LAYERS - 2):
        g = jax.random.normal(keys[NUM_LAYERS + i], (1, NUM_KERNELS, 1, 1),
                              jnp.float32) * (2.0 / 9.0 / 64.0)
        gammas.append(jnp.clip(g, -0.025, 0.025))

    running_sd = [jnp.ones((1, NUM_KERNELS, 1, 1), jnp.float32)
                  for _ in range(NUM_LAYERS - 2)]

    x = jax.random.normal(keys[-1], (N, NUM_CHANNELS, H, W), jnp.float32)

    fwd = jax.jit(lambda a, wt, g, r: bfcnn_forward(a, wt, g, r, tile_m=TILE_M))
    out, new_rsd = fwd(x, weights, gammas, running_sd)
    out = jax.block_until_ready(out)

    ref_out, ref_sds = _ref_forward(x, weights, gammas)

    # tolerance sized for bf16 matmul inputs with f32 accumulation
    ref_scale = float(jnp.max(jnp.abs(ref_out)))
    max_err = float(jnp.max(jnp.abs(out - ref_out)))
    if max_err > 2e-2 * ref_scale + 1e-5:
        raise AssertionError(
            f"Pallas BFCNN output mismatch: max_err={max_err:.3e} scale={ref_scale:.3e}")

    for i, sd in enumerate(ref_sds):
        ref_rsd = 0.9 * running_sd[i] + 0.1 * sd
        if not jnp.allclose(new_rsd[i], ref_rsd, rtol=1e-2, atol=1e-4):
            raise AssertionError(f"running_sd mismatch at mid layer {i}")

    print("KERNEL_OK")
</pallas_src>

<mosaic_0001>
module attributes {stable_mosaic.version = 11 : i64} {
  func.func @_matmul_kernel(%arg0: i32, %arg1: memref<128x128xbf16, #tpu.memory_space<vmem>>, %arg2: memref<128x64xbf16, #tpu.memory_space<vmem>>, %arg3: memref<128x64xbf16, #tpu.memory_space<vmem>>) attributes {dimension_semantics = [#tpu.dimension_semantics<parallel>], iteration_bounds = array<i64: 4>, scalar_prefetch = 0 : i64, scratch_operands = 0 : i64, tpu.core_type = #tpu.core_type<tc>, window_params = [{transform_indices = @transform_0, window_bounds = array<i64: 128, 128>}, {pipeline_mode = #tpu.pipeline_mode<synchronous>, transform_indices = @transform_1, window_bounds = array<i64: 128, 64>}, {transform_indices = @transform_2, window_bounds = array<i64: 128, 64>}]} {
    %c0 = arith.constant 0 : index
    %c0_0 = arith.constant 0 : index
    %0 = vector.load %arg1[%c0, %c0_0] : memref<128x128xbf16, #tpu.memory_space<vmem>>, vector<128x128xbf16>
    %c0_1 = arith.constant 0 : index
    %c0_2 = arith.constant 0 : index
    %1 = vector.load %arg2[%c0_1, %c0_2] : memref<128x64xbf16, #tpu.memory_space<vmem>>, vector<128x64xbf16>
    %cst = arith.constant dense<0.000000e+00> : vector<128x64xf32>
    %2 = tpu.matmul %0, %1, %cst {dimension_numbers = #tpu.dot_dimension_numbers<[1], [0], [0], [1], [0, 0, 1, 1], [], []>} : vector<128x128xbf16>, vector<128x64xbf16>, vector<128x64xf32> -> vector<128x64xf32>
    %cst_3 = arith.constant 0.000000e+00 : f32
    %3 = vector.broadcast %cst_3 : f32 to vector<128x64xf32>
    %4 = arith.maximumf %2, %3 : vector<128x64xf32>
    %5 = arith.truncf %4 : vector<128x64xf32> to vector<128x64xbf16>
    %c0_4 = arith.constant 0 : index
    %c0_5 = arith.constant 0 : index
    %6 = vector.load %arg3[%c0_4, %c0_5] : memref<128x64xbf16, #tpu.memory_space<vmem>>, vector<128x64xbf16>
    tpu.vector_store %arg3[%c0_4, %c0_5], %5 {strides = array<i32>} : memref<128x64xbf16, #tpu.memory_space<vmem>>, vector<128x64xbf16>,
    return
  }
  func.func @transform_0(%arg0: i32) -> (i32, i32) {
    %c0_i32 = arith.constant 0 : i32
    %c0_i32_0 = arith.constant 0 : i32
    return %arg0, %c0_i32 : i32, i32
  }
  func.func @transform_1(%arg0: i32) -> (i32, i32) {
    %c0_i32 = arith.constant 0 : i32
    %c0_i32_0 = arith.constant 0 : i32
    %c0_i32_1 = arith.constant 0 : i32
    return %c0_i32, %c0_i32_0 : i32, i32
  }
  func.func @transform_2(%arg0: i32) -> (i32, i32) {
    %c0_i32 = arith.constant 0 : i32
    %c0_i32_0 = arith.constant 0 : i32
    return %arg0, %c0_i32 : i32, i32
  }
}

module attributes {stable_mosaic.version = 11 : i64} {
  func.func @_mid_layer_kernel(%arg0: i32, %arg1: memref<128x576xbf16, #tpu.memory_space<vmem>>, %arg2: memref<576x64xbf16, #tpu.memory_space<vmem>>, %arg3: memref<1x64xf32, #tpu.memory_space<vmem>>, %arg4: memref<512x64xbf16, #tpu.memory_space<vmem>>, %arg5: memref<1x64xf32, #tpu.memory_space<vmem>>, %arg6: memref<1x64xf32, #tpu.memory_space<vmem>>, %arg7: memref<1x64xf32, #tpu.memory_space<vmem>>) attributes {dimension_semantics = [#tpu.dimension_semantics<arbitrary>], iteration_bounds = array<i64: 4>, scalar_prefetch = 0 : i64, scratch_operands = 2 : i64, tpu.core_type = #tpu.core_type<tc>, window_params = [{transform_indices = @transform_0, window_bounds = array<i64: 128, 576>}, {pipeline_mode = #tpu.pipeline_mode<synchronous>, transform_indices = @transform_1, window_bounds = array<i64: 576, 64>}, {pipeline_mode = #tpu.pipeline_mode<synchronous>, transform_indices = @transform_2, window_bounds = array<i64: 1, 64>}, {pipeline_mode = #tpu.pipeline_mode<synchronous>, transform_indices = @transform_3, window_bounds = array<i64: 512, 64>}, {pipeline_mode = #tpu.pipeline_mode<synchronous>, transform_indices = @transform_4, window_bounds = array<i64: 1, 64>}]} {
    %c0_i32 = arith.constant 0 : i32
    %0 = arith.cmpi eq, %arg0, %c0_i32 : i32
    %1 = arith.extui %0 : i1 to i32
    %c0_i32_0 = arith.constant 0 : i32
    %2 = arith.cmpi ne, %1, %c0_i32_0 : i32
    scf.if %2 {
      %cst_16 = arith.constant 0.000000e+00 : f32
      %25 = vector.broadcast %cst_16 : f32 to vector<1x64xf32>
      %c0_17 = arith.constant 0 : index
      %c0_18 = arith.constant 0 : index
      %26 = vector.load %arg6[%c0_17, %c0_18] : memref<1x64xf32, #tpu.memory_space<vmem>>, vector<1x64xf32>
      tpu.vector_store %arg6[%c0_17, %c0_18], %25 {strides = array<i32>} : memref<1x64xf32, #tpu.memory_space<vmem>>, vector<1x64xf32>,
      %cst_19 = arith.constant 0.000000e+00 : f32
      %27 = vector.broadcast %cst_19 : f32 to vector<1x64xf32>
      %c0_20 = arith.constant 0 : index
      %c0_21 = arith.constant 0 : index
      %28 = vector.load %arg7[%c0_20, %c0_21] : memref<1x64xf32, #tpu.memory_space<vmem>>, vector<1x64xf32>
      tpu.vector_store %arg7[%c0_20, %c0_21], %27 {strides = array<i32>} : memref<1x64xf32, #tpu.memory_space<vmem>>, vector<1x64xf32>,
    } else {
    }
    %c0 = arith.constant 0 : index
    %c0_1 = arith.constant 0 : index
    %3 = vector.load %arg1[%c0, %c0_1] : memref<128x576xbf16, #tpu.memory_space<vmem>>, vector<128x576xbf16>
    %c0_2 = arith.constant 0 : index
    %c0_3 = arith.constant 0 : index
    %4 = vector.load %arg2[%c0_2, %c0_3] : memref<576x64xbf16, #tpu.memory_space<vmem>>, vector<576x64xbf16>
    %cst = arith.constant dense<0.000000e+00> : vector<128x64xf32>
    %5 = tpu.matmul %3, %4, %cst {dimension_numbers = #tpu.dot_dimension_numbers<[1], [0], [0], [1], [0, 0, 1, 1], [], []>} : vector<128x576xbf16>, vector<576x64xbf16>, vector<128x64xf32> -> vector<128x64xf32>
    %c0_4 = arith.constant 0 : index
    %c0_5 = arith.constant 0 : index
    %6 = vector.load %arg6[%c0_4, %c0_5] : memref<1x64xf32, #tpu.memory_space<vmem>>, vector<1x64xf32>
    %cst_6 = arith.constant dense<0.000000e+00> : vector<64xf32>
    %7 = vector.multi_reduction <add>, %5, %cst_6 [0] : vector<128x64xf32> to vector<64xf32>
    %8 = vector.shape_cast %7 : vector<64xf32> to vector<1x64xf32>
    %9 = arith.addf %6, %8 : vector<1x64xf32>
    %c0_7 = arith.constant 0 : index
    %c0_8 = arith.constant 0 : index
    %10 = vector.load %arg6[%c0_7, %c0_8] : memref<1x64xf32, #tpu.memory_space<vmem>>, vector<1x64xf32>
    tpu.vector_store %arg6[%c0_7, %c0_8], %9 {strides = array<i32>} : memref<1x64xf32, #tpu.memory_space<vmem>>, vector<1x64xf32>,
    %c0_9 = arith.constant 0 : index
    %c0_10 = arith.constant 0 : index
    %11 = vector.load %arg7[%c0_9, %c0_10] : memref<1x64xf32, #tpu.memory_space<vmem>>, vector<1x64xf32>
    %12 = arith.mulf %5, %5 : vector<128x64xf32>
    %cst_11 = arith.constant dense<0.000000e+00> : vector<64xf32>
    %13 = vector.multi_reduction <add>, %12, %cst_11 [0] : vector<128x64xf32> to vector<64xf32>
    %14 = vector.shape_cast %13 : vector<64xf32> to vector<1x64xf32>
    %15 = arith.addf %11, %14 : vector<1x64xf32>
    %c0_12 = arith.constant 0 : index
    %c0_13 = arith.constant 0 : index
    %16 = vector.load %arg7[%c0_12, %c0_13] : memref<1x64xf32, #tpu.memory_space<vmem>>, vector<1x64xf32>
    tpu.vector_store %arg7[%c0_12, %c0_13], %15 {strides = array<i32>} : memref<1x64xf32, #tpu.memory_space<vmem>>, vector<1x64xf32>,
    %c128_i32 = arith.constant 128 : i32
    %17 = arith.muli %arg0, %c128_i32 : i32
    %18 = tpu.assume_multiple %17, 128 : i32
    %19 = arith.truncf %5 : vector<128x64xf32> to vector<128x64xbf16>
    %20 = arith.index_cast %18 : i32 to index
    %c0_14 = arith.constant 0 : index
    %21 = vector.load %arg4[%20, %c0_14] : memref<512x64xbf16, #tpu.memory_space<vmem>>, vector<128x64xbf16>
    tpu.vector_store %arg4[%20, %c0_14], %19 {strides = array<i32>} : memref<512x64xbf16, #tpu.memory_space<vmem>>, vector<128x64xbf16>,
    %c3_i32 = arith.constant 3 : i32
    %22 = arith.cmpi eq, %arg0, %c3_i32 : i32
    %23 = arith.extui %22 : i1 to i32
    %c0_i32_15 = arith.constant 0 : i32
    %24 = arith.cmpi ne, %23, %c0_i32_15 : i32
    scf.if %24 {
      %c0_16 = arith.constant 0 : index
      %c0_17 = arith.constant 0 : index
      %25 = vector.load %arg6[%c0_16, %c0_17] : memref<1x64xf32, #tpu.memory_space<vmem>>, vector<1x64xf32>
      %cst_18 = arith.constant 0.001953125 : f32
      %26 = vector.broadcast %cst_18 : f32 to vector<1x64xf32>
      %27 = arith.mulf %25, %26 : vector<1x64xf32>
      %c0_19 = arith.constant 0 : index
      %c0_20 = arith.constant 0 : index
      %28 = vector.load %arg7[%c0_19, %c0_20] : memref<1x64xf32, #tpu.memory_space<vmem>>, vector<1x64xf32>
      %cst_21 = arith.constant 0.001953125 : f32
      %29 = vector.broadcast %cst_21 : f32 to vector<1x64xf32>
      %30 = arith.mulf %28, %29 : vector<1x64xf32>
      %31 = arith.mulf %27, %27 : vector<1x64xf32>
      %32 = arith.subf %30, %31 : vector<1x64xf32>
      %cst_22 = arith.constant 9.99999974E-6 : f32
      %33 = vector.broadcast %cst_22 : f32 to vector<1x64xf32>
      %34 = arith.addf %32, %33 : vector<1x64xf32>
      %35 = math.sqrt %34 : vector<1x64xf32>
      %c0_23 = arith.constant 0 : index
      %c0_24 = arith.constant 0 : index
      %36 = vector.load %arg5[%c0_23, %c0_24] : memref<1x64xf32, #tpu.memory_space<vmem>>, vector<1x64xf32>
      tpu.vector_store %arg5[%c0_23, %c0_24], %35 {strides = array<i32>} : memref<1x64xf32, #tpu.memory_space<vmem>>, vector<1x64xf32>,
      %cst_25 = arith.constant 9.99999974E-6 : f32
      %37 = vector.broadcast %cst_25 : f32 to vector<1x64xf32>
      %38 = arith.addf %32, %37 : vector<1x64xf32>
      %39 = math.rsqrt %38 : vector<1x64xf32>
      %c0_26 = arith.constant 0 : index
      %c0_27 = arith.constant 0 : index
      %40 = vector.load %arg3[%c0_26, %c0_27] : memref<1x64xf32, #tpu.memory_space<vmem>>, vector<1x64xf32>
      %41 = arith.mulf %39, %40 : vector<1x64xf32>
      %c0_i32_28 = arith.constant 0 : i32
      %c4_i32 = arith.constant 4 : i32
      %42 = arith.addi %c0_i32_28, %c4_i32 : i32
      %c1_i32 = arith.constant 1 : i32
      scf.for %arg8 = %c0_i32_28 to %42 step %c1_i32  : i32 {
        %c128_i32_30 = arith.constant 128 : i32
        %43 = arith.muli %arg8, %c128_i32_30 : i32
        %44 = tpu.assume_multiple %43, 128 : i32
        %45 = arith.index_cast %44 : i32 to index
        %c0_31 = arith.constant 0 : index
        %46 = vector.load %arg4[%45, %c0_31] : memref<512x64xbf16, #tpu.memory_space<vmem>>, vector<128x64xbf16>
        %47 = arith.extf %46 : vector<128x64xbf16> to vector<128x64xf32>
        %48 = vector.broadcast %41 : vector<1x64xf32> to vector<128x64xf32>
        %49 = arith.mulf %47, %48 : vector<128x64xf32>
        %cst_32 = arith.constant 0.000000e+00 : f32
        %50 = vector.broadcast %cst_32 : f32 to vector<128x64xf32>
        %51 = arith.maximumf %49, %50 : vector<128x64xf32>
        %52 = arith.truncf %51 : vector<128x64xf32> to vector<128x64xbf16>
        %53 = arith.index_cast %44 : i32 to index
        %c0_33 = arith.constant 0 : index
        %54 = vector.load %arg4[%53, %c0_33] : memref<512x64xbf16, #tpu.memory_space<vmem>>, vector<128x64xbf16>
        tpu.vector_store %arg4[%53, %c0_33], %52 {strides = array<i32>} : memref<512x64xbf16, #tpu.memory_space<vmem>>, vector<128x64xbf16>,
      }
      %c4_i32_29 = arith.constant 4 : i32
    } else {
    }
    return
  }
  func.func @transform_0(%arg0: i32) -> (i32, i32) {
    %c0_i32 = arith.constant 0 : i32
    %c0_i32_0 = arith.constant 0 : i32
    return %arg0, %c0_i32 : i32, i32
  }
  func.func @transform_1(%arg0: i32) -> (i32, i32) {
    %c0_i32 = arith.constant 0 : i32
    %c0_i32_0 = arith.constant 0 : i32
    %c0_i32_1 = arith.constant 0 : i32
    return %c0_i32, %c0_i32_0 : i32, i32
  }
  func.func @transform_2(%arg0: i32) -> (i32, i32) {
    %c0_i32 = arith.constant 0 : i32
    %c0_i32_0 = arith.constant 0 : i32
    %c0_i32_1 = arith.constant 0 : i32
    return %c0_i32, %c0_i32_0 : i32, i32
  }
  func.func @transform_3(%arg0: i32) -> (i32, i32) {
    %c0_i32 = arith.constant 0 : i32
    %c0_i32_0 = arith.constant 0 : i32
    %c0_i32_1 = arith.constant 0 : i32
    return %c0_i32, %c0_i32_0 : i32, i32
  }
  func.func @transform_4(%arg0: i32) -> (i32, i32) {
    %c0_i32 = arith.constant 0 : i32
    %c0_i32_0 = arith.constant 0 : i32
    %c0_i32_1 = arith.constant 0 : i32
    return %c0_i32, %c0_i32_0 : i32, i32
  }
}

module attributes {stable_mosaic.version = 11 : i64} {
  func.func @_matmul_kernel(%arg0: i32, %arg1: memref<128x576xbf16, #tpu.memory_space<vmem>>, %arg2: memref<576x128xbf16, #tpu.memory_space<vmem>>, %arg3: memref<128x128xf32, #tpu.memory_space<vmem>>) attributes {dimension_semantics = [#tpu.dimension_semantics<parallel>], iteration_bounds = array<i64: 4>, scalar_prefetch = 0 : i64, scratch_operands = 0 : i64, tpu.core_type = #tpu.core_type<tc>, window_params = [{transform_indices = @transform_0, window_bounds = array<i64: 128, 576>}, {pipeline_mode = #tpu.pipeline_mode<synchronous>, transform_indices = @transform_1, window_bounds = array<i64: 576, 128>}, {transform_indices = @transform_2, window_bounds = array<i64: 128, 128>}]} {
    %c0 = arith.constant 0 : index
    %c0_0 = arith.constant 0 : index
    %0 = vector.load %arg1[%c0, %c0_0] : memref<128x576xbf16, #tpu.memory_space<vmem>>, vector<128x576xbf16>
    %c0_1 = arith.constant 0 : index
    %c0_2 = arith.constant 0 : index
    %1 = vector.load %arg2[%c0_1, %c0_2] : memref<576x128xbf16, #tpu.memory_space<vmem>>, vector<576x128xbf16>
    %cst = arith.constant dense<0.000000e+00> : vector<128x128xf32>
    %2 = tpu.matmul %0, %1, %cst {dimension_numbers = #tpu.dot_dimension_numbers<[1], [0], [0], [1], [0, 0, 1, 1], [], []>} : vector<128x576xbf16>, vector<576x128xbf16>, vector<128x128xf32> -> vector<128x128xf32>
    %c0_3 = arith.constant 0 : index
    %c0_4 = arith.constant 0 : index
    %3 = vector.load %arg3[%c0_3, %c0_4] : memref<128x128xf32, #tpu.memory_space<vmem>>, vector<128x128xf32>
    tpu.vector_store %arg3[%c0_3, %c0_4], %2 {strides = array<i32>} : memref<128x128xf32, #tpu.memory_space<vmem>>, vector<128x128xf32>,
    return
  }
  func.func @transform_0(%arg0: i32) -> (i32, i32) {
    %c0_i32 = arith.constant 0 : i32
    %c0_i32_0 = arith.constant 0 : i32
    return %arg0, %c0_i32 : i32, i32
  }
  func.func @transform_1(%arg0: i32) -> (i32, i32) {
    %c0_i32 = arith.constant 0 : i32
    %c0_i32_0 = arith.constant 0 : i32
    %c0_i32_1 = arith.constant 0 : i32
    return %c0_i32, %c0_i32_0 : i32, i32
  }
  func.func @transform_2(%arg0: i32) -> (i32, i32) {
    %c0_i32 = arith.constant 0 : i32
    %c0_i32_0 = arith.constant 0 : i32
    return %arg0, %c0_i32 : i32, i32
  }
}

</mosaic_0001>

<bundles_post_ra>
// kernel: _lambda_.6
= control target key start
LH: loop header
LB: loop body
LE: loop exit
PB: predicated region body
PF: predicated region fallthrough
CT: control target
= control target key end

     0   :  { %s696_s9 = smov 0   ;;  %s788_s0 = inlined_call_operand.vmem [shape: bf16[512,128], index: 0, kind: input, shape index: {}]   ;;  %s789_s1 = inlined_call_operand.vmem [shape: bf16[128,64], index: 1, kind: input, shape index: {}]   ;;  %s790_s2 = inlined_call_operand.vmem [shape: bf16[512,64], index: 2, kind: output, shape index: {}]  }
   0x1 LB: > { %s526_s10 = sadd.s32 4294967295, %s679_s9   ;;  %p530_p0 = scmp.ge.s32.totalorder %s679_s9, 1  ;;  %s679_s9 = sphi %s696_s9, %s12_s9  }
   0x2   : > { %p113_p1 = scmp.lt.s32.totalorder %s679_s9, 5 }
   0x4   : > { %p114_p2 = pnand %p530_p0, %p113_p1 }
   0x5   : > { %v657_v0 = vld [vmem:[%s789_s1] sm:$0xff] (!%p114_p2)   ;;  %s531_s13 = sshll.u32 (!%p114_p2), %s526_s10, 4  ;;  %v658_v1 = vld [vmem:[%s789_s1 + $0x8] sm:$0xff] (!%p114_p2)   ;;  %v659_v2 = vld [vmem:[%s789_s1 + $0x10] sm:$0xff] (!%p114_p2)   ;;  %vm453_vm0 = vcmask (!%p114_p2), 519168  }
   0x6   : > { %117 = sbr.rel (%p114_p2) target bundleno = 266 (0x10a), region = 28  ;;  %p136_p3 = scmp.lt.s32.totalorder (!%p114_p2), %s531_s13, 63  ;;  %601 = vmatprep.subr.bf16.mxu0 (!%p114_p2), %v657_v0  ;;  %633 = vmatprep.subr.bf16.mxu1 (!%p114_p2), %v657_v0  ;;  %v660_v3 = vld [vmem:[%s789_s1 + $0x18] sm:$0xff] (!%p114_p2)   ;;  %v661_v6 = vld [vmem:[%s789_s1 + $0x20] sm:$0xff] (!%p114_p2)   ;;  %v662_v7 = vld [vmem:[%s789_s1 + $0x28] sm:$0xff] (!%p114_p2)  }
   0x7   : > { %602 = vmatpush3.bf16.msra.mxu0 (!%p114_p2), %v657_v0  ;;  %641 = vmatpush3.bf16.msra.mxu1 (!%p114_p2), %v657_v0  ;;  %v663_v8 = vld [vmem:[%s789_s1 + $0x30] sm:$0xff] (!%p114_p2)   ;;  %v664_v9 = vld [vmem:[%s789_s1 + $0x38] sm:$0xff] (!%p114_p2)  }
   0x8   : > { %603 = vmatprep.subr.bf16.mxu0 (!%p114_p2), %v658_v1  ;;  %634 = vmatprep.subr.bf16.mxu1 (!%p114_p2), %v658_v1 }
   0xb   : > { %604 = vmatpush3.bf16.msra.mxu0 (!%p114_p2), %v658_v1  ;;  %642 = vmatpush3.bf16.msra.mxu1 (!%p114_p2), %v658_v1 }
   0xc   : > { %605 = vmatprep.subr.bf16.mxu0 (!%p114_p2), %v659_v2  ;;  %635 = vmatprep.subr.bf16.mxu1 (!%p114_p2), %v659_v2 }
   0xd   : > { %s792_s13 = smov (!%p136_p3, %s531_s13), 63 }
   0xe   : > { %s532_s18 = sshll.u32 %s792_s13, 2 }
   0xf   : > { %s721_s21 = scalar_lea.vmem %s788_s0, %s532_s18  ;;  %606 = vmatpush3.bf16.msra.mxu0 %v659_v2  ;;  %643 = vmatpush3.bf16.msra.mxu1 %v659_v2  ;;  %s751_s6 = scalar_lea.vmem %s790_s2, %s532_s18 }
  0x10   : > { %v665_v4 = vld [vmem:[%s721_s21] sm:$0xff]   ;;  %607 = vmatprep.subr.bf16.mxu0 %v660_v3  ;;  %636 = vmatprep.subr.bf16.mxu1 %v660_v3  ;;  %v667_v10 = vld [vmem:[%s721_s21 + $0x8] sm:$0xff]   ;;  %v669_v12 = vld [vmem:[%s721_s21 + $0x10] sm:$0xff]  }
  0x11   : > { %v666_v5 = vld [vmem:[%s721_s21 + $0x20] sm:$0xff]   ;;  %617 = vmatprep.mubr.bf16.mxu0 %v665_v4  ;;  %v668_v11 = vld [vmem:[%s721_s21 + $0x28] sm:$0xff]   ;;  %v670_v13 = vld [vmem:[%s721_s21 + $0x30] sm:$0xff]  }
  0x12   : > { %625 = vmatprep.mubr.bf16.mxu1 %v666_v5  ;;  %v671_v14 = vld [vmem:[%s721_s21 + $0x18] sm:$0xff]  }
  0x13   : > { %608 = vmatpush3.bf16.msra.mxu0 %v660_v3  ;;  %644 = vmatpush3.bf16.msra.mxu1 %v660_v3  ;;  %v672_v15 = vld [vmem:[%s721_s21 + $0x38] sm:$0xff]  }
  0x14   : > { %609 = vmatprep.subr.bf16.mxu0 %v661_v6  ;;  %637 = vmatprep.subr.bf16.mxu1 %v661_v6 }
  0x17   : > { %610 = vmatpush3.bf16.msra.mxu0 %v661_v6  ;;  %645 = vmatpush3.bf16.msra.mxu1 %v661_v6 }
  0x18   : > { %611 = vmatprep.subr.bf16.mxu0 %v662_v7  ;;  %638 = vmatprep.subr.bf16.mxu1 %v662_v7 }
  0x1b   : > { %612 = vmatpush3.bf16.msra.mxu0 %v662_v7  ;;  %646 = vmatpush3.bf16.msra.mxu1 %v662_v7 }
  0x1c   : > { %613 = vmatprep.subr.bf16.mxu0 %v663_v8  ;;  %639 = vmatprep.subr.bf16.mxu1 %v663_v8 }
  0x1f   : > { %614 = vmatpush3.bf16.msra.mxu0 %v663_v8  ;;  %647 = vmatpush3.bf16.msra.mxu1 %v663_v8 }
  0x20   : > { %615 = vmatprep.subr.bf16.mxu0 %v664_v9  ;;  %640 = vmatprep.subr.bf16.mxu1 %v664_v9 }
  0x23   : > { %616 = vmatpush3.bf16.msra.mxu0 %v664_v9  ;;  %648 = vmatpush3.bf16.msra.mxu1 %v664_v9 }
  0x26   : > { %618 = vmatmul.mubr.bf16.vlgmr.msra.gmra.mrb[0].mxu0 %v667_v10  ;;  %626 = vmatmul.mubr.bf16.vlgmr.msra.gmra.mrb[0].mxu1 %v668_v11 }
  0x27   : > { %621 = vmatprep.mubr.bf16.mxu0 %v669_v12  ;;  %629 = vmatprep.mubr.bf16.mxu1 %v670_v13 }
  0x2e   : > { %622 = vmatmul.mubr.bf16.gmra.mrb[4].mxu0 %v671_v14  ;;  %630 = vmatmul.mubr.bf16.gmra.mrb[4].mxu1 %v672_v15 }
  0xf9   : > { %v619_v16 = vpop.f32.mrb[0].mxu0  ;;  %v627_v17 = vpop.f32.mrb[0].mxu1 }
  0xfa   : > { %v375_v18 = vmax.f32 %v619_v16, 0.0  ;;  %v383_v19 = vmax.f32 %v627_v17, 0.0  ;;  %v310_v20 = vpop.f32.mrb[1].mxu0  ;;  %v342_v21 = vpop.f32.mrb[1].mxu1 }
  0xfb   : > { %v373_v22 = vmax.f32 %v310_v20, 0.0  ;;  %v381_v23 = vmax.f32 %v342_v21, 0.0  ;;  %v620_v24 = vpop.f32.mrb[2].mxu0  ;;  %v628_v25 = vpop.f32.mrb[2].mxu1 }
  0xfc   : > { %v571_v26 = vpack.c.bf16 %v375_v18, %v375_v18  ;;  %v579_v27 = vpack.c.bf16 %v383_v19, %v383_v19  ;;  %v376_v28 = vmax.f32 %v620_v24, 0.0  ;;  %v384_v29 = vmax.f32 %v628_v25, 0.0  ;;  %v313_v30 = vpop.f32.mrb[3].mxu0  ;;  %v345_v31 = vpop.f32.mrb[3].mxu1 }
  0xfd   : > { %v569_v32 = vpack.c.bf16 %v373_v22, %v373_v22  ;;  %v577_v33 = vpack.c.bf16 %v381_v23, %v381_v23  ;;  %v374_v34 = vmax.f32 %v313_v30, 0.0  ;;  %v382_v35 = vmax.f32 %v345_v31, 0.0 }
  0xfe   : > { %456 = vst.msk [vmem:[%s751_s6 + $0x8] sm:$0xf] %vm453_vm0, %v571_v26  ;;  %464 = vst.msk [vmem:[%s751_s6 + $0x28] sm:$0xf] %vm453_vm0, %v579_v27  ;;  %v572_v36 = vpack.c.bf16 %v376_v28, %v376_v28  ;;  %v580_v37 = vpack.c.bf16 %v384_v29, %v384_v29 }
  0xff   : > { %454 = vst.msk [vmem:[%s751_s6] sm:$0xf] %vm453_vm0, %v569_v32  ;;  %462 = vst.msk [vmem:[%s751_s6 + $0x20] sm:$0xf] %vm453_vm0, %v577_v33  ;;  %v570_v38 = vpack.c.bf16 %v374_v34, %v374_v34  ;;  %v578_v39 = vpack.c.bf16 %v382_v35, %v382_v35 }
 0x100   : > { %457 = vst.msk [vmem:[%s751_s6 + $0xc] sm:$0xf] %vm453_vm0, %v572_v36  ;;  %465 = vst.msk [vmem:[%s751_s6 + $0x2c] sm:$0xf] %vm453_vm0, %v580_v37 }
 0x101   : > { %455 = vst.msk [vmem:[%s751_s6 + $0x4] sm:$0xf] %vm453_vm0, %v570_v38  ;;  %463 = vst.msk [vmem:[%s751_s6 + $0x24] sm:$0xf] %vm453_vm0, %v578_v39  ;;  %v623_v40 = vpop.f32.mrb[4].mxu0  ;;  %v631_v41 = vpop.f32.mrb[4].mxu1 }
 0x102   : > { %v379_v42 = vmax.f32 %v623_v40, 0.0  ;;  %v387_v43 = vmax.f32 %v631_v41, 0.0  ;;  %v326_v44 = vpop.f32.mrb[5].mxu0  ;;  %v358_v45 = vpop.f32.mrb[5].mxu1 }
 0x103   : > { %v377_v46 = vmax.f32 %v326_v44, 0.0  ;;  %v385_v47 = vmax.f32 %v358_v45, 0.0  ;;  %v624_v48 = vpop.f32.mrb[6].mxu0  ;;  %v632_v49 = vpop.f32.mrb[6].mxu1 }
 0x104   : > { %v575_v50 = vpack.c.bf16 %v379_v42, %v379_v42  ;;  %v583_v51 = vpack.c.bf16 %v387_v43, %v387_v43  ;;  %v380_v52 = vmax.f32 %v624_v48, 0.0  ;;  %v388_v53 = vmax.f32 %v632_v49, 0.0  ;;  %v329_v54 = vpop.f32.mrb[7].mxu0  ;;  %v361_v55 = vpop.f32.mrb[7].mxu1 }
 0x105   : > { %v573_v56 = vpack.c.bf16 %v377_v46, %v377_v46  ;;  %v581_v57 = vpack.c.bf16 %v385_v47, %v385_v47  ;;  %v378_v58 = vmax.f32 %v329_v54, 0.0  ;;  %v386_v59 = vmax.f32 %v361_v55, 0.0 }
 0x106   : > { %460 = vst.msk [vmem:[%s751_s6 + $0x18] sm:$0xf] %vm453_vm0, %v575_v50  ;;  %468 = vst.msk [vmem:[%s751_s6 + $0x38] sm:$0xf] %vm453_vm0, %v583_v51  ;;  %v576_v60 = vpack.c.bf16 %v380_v52, %v380_v52  ;;  %v584_v61 = vpack.c.bf16 %v388_v53, %v388_v53 }
 0x107   : > { %458 = vst.msk [vmem:[%s751_s6 + $0x10] sm:$0xf] %vm453_vm0, %v573_v56  ;;  %466 = vst.msk [vmem:[%s751_s6 + $0x30] sm:$0xf] %vm453_vm0, %v581_v57  ;;  %v574_v62 = vpack.c.bf16 %v378_v58, %v378_v58  ;;  %v582_v63 = vpack.c.bf16 %v386_v59, %v386_v59 }
 0x108   : > { %461 = vst.msk [vmem:[%s751_s6 + $0x1c] sm:$0xf] %vm453_vm0, %v576_v60  ;;  %469 = vst.msk [vmem:[%s751_s6 + $0x3c] sm:$0xf] %vm453_vm0, %v584_v61 }
 0x109   : > { %459 = vst.msk [vmem:[%s751_s6 + $0x14] sm:$0xf] %vm453_vm0, %v574_v62  ;;  %467 = vst.msk [vmem:[%s751_s6 + $0x34] sm:$0xf] %vm453_vm0, %v582_v63 }
 0x10a PF: > { %s12_s9 = sadd.s32 1, %s679_s9  }
 0x10b   : > { %p9_p4 = scmp.ge.s32.totalorder %s12_s9, 6  }
 0x10d   :  { %11 = sbr.rel (!%p9_p4) target bundleno = 1 (0x1), region = 58 }

// kernel: _lambda_.7
= control target key start
LH: loop header
LB: loop body
LE: loop exit
PB: predicated region body
PF: predicated region fallthrough
CT: control target
= control target key end

     0   :  { %s1982_s15 = smov 0   ;;  %s2391_s0 = inlined_call_operand.vmem [shape: bf16[512,576], index: 0, kind: input, shape index: {}]   ;;  %s2392_s1 = inlined_call_operand.vmem [shape: bf16[576,64], index: 1, kind: input, shape index: {}]   ;;  %s2393_s2 = inlined_call_operand.vmem [shape: f32[1,64], index: 2, kind: input, shape index: {}]   ;;  %s2394_s3 = inlined_call_operand.vmem [shape: bf16[512,64], index: 3, kind: output, shape index: {0}]   ;;  %s2395_s4 = inlined_call_operand.vmem [shape: f32[1,64], index: 4, kind: output, shape index: {1}]  }
   0x1 LB: > { %s1988_s16 = sadd.s32 4294967295, %s1950_s15   ;;  %p1458_p0 = scmp.ge.s32.totalorder %s1950_s15, 1  ;;  %s1950_s15 = sphi %s1982_s15, %s15_s15  }
   0x2   : > { %p157_p1 = scmp.lt.s32.totalorder %s1950_s15, 5 }
   0x4   : > { %p158_p2 = pnand %p1458_p0, %p157_p1 }
   0x5   : > { %s1459_s17 = sshll.u32 (!%p158_p2), %s1988_s16, 4  ;;  %p1461_p4 = scmp.ne.s32.totalorder (!%p158_p2), %s1988_s16, 0 }
   0x6   : > { %161 = sbr.rel (%p158_p2) target bundleno = 439 (0x1b7), region = 32  ;;  %p180_p3 = scmp.lt.s32.totalorder (!%p158_p2), %s1459_s17, 63 }
   0xd   : > { %s2397_s17 = smov (!%p180_p3, %s1459_s17), 63  ;;  %190 = sbr.rel (%p1461_p4) target bundleno = 20 (0x14), region = 36 }
   0xe   : > { %s1828_s18 = smul.u32 20, %s2397_s17  ;;  %vm191_vm0 = vcmask (!%p1461_p4), 516096   ;;  %v1956_v0 = vmov (!%p1461_p4), 0.0  }
   0xf   : > { %192 = vst.msk [vmem:[#allocation2] sm:$0x1] (!%p1461_p4), %vm191_vm0, %v1956_v0  ;;  %193 = vst.msk [vmem:[#allocation3] sm:$0x1] (!%p1461_p4), %vm191_vm0, %v1956_v0 }
  0x10   : > { %s1996_s21 = scalar_lea.vmem %s2391_s0, %s1828_s18 }
  0x14 PF: > { %v1846_v1 = vld [vmem:[%s2392_s1 + $0x40] sm:$0xff]   ;;  %v1850_v5 = vld [vmem:[%s2392_s1 + $0x48] sm:$0xff]   ;;  %v1854_v9 = vld [vmem:[%s2392_s1 + $0x50] sm:$0xff]   ;;  %vm730_vm1 = vcmask 523264   ;;  %vm1212_vm2 = vcmask 519168   ;;  %vm1085_vm3 = vcmask 516096  }
  0x15   : > { %v1847_v2 = vld [vmem:[%s2392_s1 + $0xc0] sm:$0xff]   ;;  %1656 = vmatprep.subr.bf16.mxu0 %v1846_v1  ;;  %v1851_v6 = vld [vmem:[%s2392_s1 + $0xc8] sm:$0xff]   ;;  %v1855_v10 = vld [vmem:[%s2392_s1 + $0xd0] sm:$0xff]   ;;  %p1564_p5 = scmp.ne.s32.totalorder %s1988_s16, 3 }
  0x16   : > { %v1848_v3 = vld [vmem:[%s2392_s1] sm:$0xff]   ;;  %1720 = vmatprep.subr.bf16.mxu1 %v1847_v2  ;;  %v1852_v7 = vld [vmem:[%s2392_s1 + $0x8] sm:$0xff]   ;;  %v1856_v11 = vld [vmem:[%s2392_s1 + $0x10] sm:$0xff]   ;;  %s2315_s7 = smov (!%p1564_p5), 0  }
  0x17   : > { %v1849_v4 = vld [vmem:[%s2392_s1 + $0x80] sm:$0xff]   ;;  %1657 = vmatpush3.bf16.msra.mxu0 %v1848_v3  ;;  %v1853_v8 = vld [vmem:[%s2392_s1 + $0x88] sm:$0xff]   ;;  %v1857_v12 = vld [vmem:[%s2392_s1 + $0x90] sm:$0xff]  }
  0x18   : > { %1721 = vmatpush3.bf16.msra.mxu1 %v1849_v4  ;;  %1658 = vmatprep.subr.bf16.mxu0 %v1850_v5  ;;  %v1858_v13 = vld [vmem:[%s2392_s1 + $0x58] sm:$0xff]   ;;  %v1862_v17 = vld [vmem:[%s2392_s1 + $0x60] sm:$0xff]   ;;  %v1866_v21 = vld [vmem:[%s2392_s1 + $0x68] sm:$0xff]  }
  0x19   : > { %1722 = vmatprep.subr.bf16.mxu1 %v1851_v6  ;;  %v1859_v14 = vld [vmem:[%s2392_s1 + $0xd8] sm:$0xff]   ;;  %v1863_v18 = vld [vmem:[%s2392_s1 + $0xe0] sm:$0xff]   ;;  %v1867_v22 = vld [vmem:[%s2392_s1 + $0xe8] sm:$0xff]  }
  0x1a   : > { %v1860_v15 = vld [vmem:[%s2392_s1 + $0x18] sm:$0xff]   ;;  %v1864_v19 = vld [vmem:[%s2392_s1 + $0x20] sm:$0xff]   ;;  %v1868_v23 = vld [vmem:[%s2392_s1 + $0x28] sm:$0xff]  }
  0x1b   : > { %1659 = vmatpush3.bf16.msra.mxu0 %v1852_v7  ;;  %v1861_v16 = vld [vmem:[%s2392_s1 + $0x98] sm:$0xff]   ;;  %v1865_v20 = vld [vmem:[%s2392_s1 + $0xa0] sm:$0xff]   ;;  %v1869_v24 = vld [vmem:[%s2392_s1 + $0xa8] sm:$0xff]  }
  0x1c   : > { %1723 = vmatpush3.bf16.msra.mxu1 %v1853_v8  ;;  %1660 = vmatprep.subr.bf16.mxu0 %v1854_v9  ;;  %v1870_v25 = vld [vmem:[%s2392_s1 + $0x70] sm:$0xff]   ;;  %v1874_v29 = vld [vmem:[%s2392_s1 + $0x78] sm:$0xff]   ;;  %v1883_v36 = vld [vmem:[%s1996_s21 + $0xc] ss:$20 sps:$4 sm:$0xff]  }
  0x1d   : > { %1724 = vmatprep.subr.bf16.mxu1 %v1855_v10  ;;  %v1871_v26 = vld [vmem:[%s2392_s1 + $0xf0] sm:$0xff]   ;;  %v1875_v30 = vld [vmem:[%s2392_s1 + $0xf8] sm:$0xff]   ;;  %v1884_v37 = vld [vmem:[%s2392_s1 + $0x100] sm:$0xff]   ;;  %884 = vmatprep.mubr.bf16.mxu1 %v1883_v36 }
  0x1e   : > { %v1872_v27 = vld [vmem:[%s2392_s1 + $0x30] sm:$0xff]   ;;  %v1876_v31 = vld [vmem:[%s2392_s1 + $0x38] sm:$0xff]   ;;  %v1885_v38 = vld [vmem:[%s1996_s21 + $0x2c] ss:$20 sps:$4 sm:$0xff]  }
  0x1f   : > { %1661 = vmatpush3.bf16.msra.mxu0 %v1856_v11  ;;  %v1873_v28 = vld [vmem:[%s2392_s1 + $0xb0] sm:$0xff]   ;;  %v1877_v32 = vld [vmem:[%s2392_s1 + $0xb8] sm:$0xff]   ;;  %v1897_v43 = vld [vmem:[%s2392_s1 + $0x108] sm:$0xff]  }
  0x20   : > { %1725 = vmatpush3.bf16.msra.mxu1 %v1857_v12  ;;  %1662 = vmatprep.subr.bf16.mxu0 %v1858_v13  ;;  %v1878_v33 = vld [vmem:[%s1996_s21] ss:$20 sps:$4 sm:$0xff]   ;;  %v1880_v34 = vld [vmem:[%s1996_s21 + $0x4] ss:$20 sps:$4 sm:$0xff]   ;;  %v1881_v35 = vld [vmem:[%s1996_s21 + $0x8] ss:$20 sps:$4 sm:$0xff]  }
  0x21   : > { %1726 = vmatprep.subr.bf16.mxu1 %v1859_v14  ;;  %787 = vmatprep.mubr.bf16.mxu0 %v1880_v34  ;;  %v1887_v39 = vld [vmem:[%s1996_s21 + $0x34] ss:$20 sps:$4 sm:$0xff]   ;;  %v1890_v41 = vld [vmem:[%s1996_s21 + $0x30] ss:$20 sps:$4 sm:$0xff]   ;;  %v1896_v46 = vld [vmem:[%s1996_s21 + $0x58] ss:$20 sps:$4 sm:$0xff]  }
  0x22   : > { %v1889_v40 = vld [vmem:[%s1996_s21 + $0x28] ss:$20 sps:$4 sm:$0xff]   ;;  %v1895_v45 = vld [vmem:[%s1996_s21 + $0x50] ss:$20 sps:$4 sm:$0xff]   ;;  %v1902_v51 = vld [vmem:[%s1996_s21 + $0x78] ss:$20 sps:$4 sm:$0xff]  }
  0x23   : > { %1663 = vmatpush3.bf16.msra.mxu0 %v1860_v15  ;;  %v1891_v42 = vld [vmem:[%s1996_s21 + $0x54] ss:$20 sps:$4 sm:$0xff]   ;;  %v1893_v44 = vld [vmem:[%s1996_s21 + $0x5c] ss:$20 sps:$4 sm:$0xff]   ;;  %v1900_v49 = vld [vmem:[%s1996_s21 + $0x84] ss:$20 sps:$4 sm:$0xff]  }
  0x24   : > { %1727 = vmatpush3.bf16.msra.mxu1 %v1861_v16  ;;  %1664 = vmatprep.subr.bf16.mxu0 %v1862_v17  ;;  %v1910_v47 = vld [vmem:[%s2392_s1 + $0x110] sm:$0xff]   ;;  %v1923_v50 = vld [vmem:[%s2392_s1 + $0x118] sm:$0xff]   ;;  %v1906_v54 = vld [vmem:[%s1996_s21 + $0xac] ss:$20 sps:$4 sm:$0xff]  }
  0x25   : > { %1728 = vmatprep.subr.bf16.mxu1 %v1863_v18  ;;  %v1898_v48 = vld [vmem:[%s1996_s21 + $0x7c] ss:$20 sps:$4 sm:$0xff]   ;;  %v1903_v52 = vld [vmem:[%s1996_s21 + $0x80] ss:$20 sps:$4 sm:$0xff]   ;;  %v1904_v53 = vld [vmem:[%s1996_s21 + $0xa4] ss:$20 sps:$4 sm:$0xff]  }
  0x26   : > { %v1908_v55 = vld [vmem:[%s1996_s21 + $0xa0] ss:$20 sps:$4 sm:$0xff]   ;;  %v1909_v56 = vld [vmem:[%s1996_s21 + $0xa8] ss:$20 sps:$4 sm:$0xff]   ;;  %v1916_v60 = vld [vmem:[%s1996_s21 + $0xd0] ss:$20 sps:$4 sm:$0xff]  }
  0x27   : > { %1665 = vmatpush3.bf16.msra.mxu0 %v1864_v19  ;;  %v1911_v57 = vld [vmem:[%s1996_s21 + $0xcc] ss:$20 sps:$4 sm:$0xff]   ;;  %v1913_v58 = vld [vmem:[%s1996_s21 + $0xd4] ss:$20 sps:$4 sm:$0xff]   ;;  %v1919_v62 = vld [vmem:[%s1996_s21 + $0xfc] ss:$20 sps:$4 sm:$0xff]  }
  0x28   : > { %1729 = vmatpush3.bf16.msra.mxu1 %v1865_v20  ;;  %1666 = vmatprep.subr.bf16.mxu0 %v1866_v21  ;;  %v1915_v59 = vld [vmem:[%s1996_s21 + $0xc8] ss:$20 sps:$4 sm:$0xff]   ;;  %v1921_v63 = vld [vmem:[%s1996_s21 + $0xf0] ss:$20 sps:$4 sm:$0xff]   ;;  %v1922_v0 = vld [vmem:[%s1996_s21 + $0xf8] ss:$20 sps:$4 sm:$0xff]  }
  0x29   : > { %1730 = vmatprep.subr.bf16.mxu1 %v1867_v22  ;;  %v1917_v61 = vld [vmem:[%s1996_s21 + $0xf4] ss:$20 sps:$4 sm:$0xff]   ;;  %v1924_v1 = vld [vmem:[%s1996_s21 + $0x11c] ss:$20 sps:$4 sm:$0xff]   ;;  %v1926_v2 = vld [vmem:[%s1996_s21 + $0x124] ss:$20 sps:$4 sm:$0xff]  }
  0x2a   : > { %v1928_v3 = vld [vmem:[%s1996_s21 + $0x118] ss:$20 sps:$4 sm:$0xff]   ;;  %v1929_v4 = vld [vmem:[%s1996_s21 + $0x120] ss:$20 sps:$4 sm:$0xff]   ;;  %v1930_v5 = vld [vmem:[%s1996_s21 + $0x10] ss:$20 sps:$4 sm:$0xff]  }
  0x2b   : > { %1667 = vmatpush3.bf16.msra.mxu0 %v1868_v23  ;;  %v1931_v6 = vld [vmem:[%s1996_s21 + $0xb0] ss:$20 sps:$4 sm:$0xff]   ;;  %v1932_v7 = vld [vmem:[%s1996_s21 + $0x38] ss:$20 sps:$4 sm:$0xff]   ;;  %v1934_v9 = vld [vmem:[%s1996_s21 + $0x60] ss:$20 sps:$4 sm:$0xff]  }
  0x2c   : > { %1731 = vmatpush3.bf16.msra.mxu1 %v1869_v24  ;;  %1668 = vmatprep.subr.bf16.mxu0 %v1870_v25  ;;  %v1933_v8 = vld [vmem:[%s1996_s21 + $0xd8] ss:$20 sps:$4 sm:$0xff]   ;;  %v1935_v10 = vld [vmem:[%s1996_s21 + $0x100] ss:$20 sps:$4 sm:$0xff]   ;;  %v1936_v11 = vld [vmem:[%s1996_s21 + $0x88] ss:$20 sps:$4 sm:$0xff]  }
  0x2d   : > { %1732 = vmatprep.subr.bf16.mxu1 %v1871_v26  ;;  %v1937_v12 = vld [vmem:[%s1996_s21 + $0x128] ss:$20 sps:$4 sm:$0xff]   ;;  %s1546_s21 = sshll.u32 %s1988_s16, 7 }
  0x2e   : > { %s1208_s25 = sshra.s32 %s1546_s21, 3 }
  0x2f   : > { %1669 = vmatpush3.bf16.msra.mxu0 %v1872_v27  ;;  %s1563_s26 = sshll.u32 %s1208_s25, 2 }
  0x30   : > { %1733 = vmatpush3.bf16.msra.mxu1 %v1873_v28  ;;  %1670 = vmatprep.subr.bf16.mxu0 %v1874_v29  ;;  %s2184_s29 = scalar_lea.vmem %s2394_s3, %s1563_s26 }
  0x31   : > { %1734 = vmatprep.subr.bf16.mxu1 %v1875_v30 }
  0x33   : > { %1671 = vmatpush3.bf16.msra.mxu0 %v1876_v31 }
  0x34   : > { %1735 = vmatpush3.bf16.msra.mxu1 %v1877_v32  ;;  %1796 = vmatprep.subr.bf16.mxu0 %v1884_v37 }
  0x35   : > { %1820 = vmatprep.subr.bf16.mxu1 %v1884_v37 }
  0x36   : > { %788 = vmatmul.mubr.bf16.vlgmr.msra.gmra.mrb[0].mxu0 %v1878_v33 }
  0x37   : > { %885 = vmatmul.mubr.bf16.vlgmr.msra.gmra.mrb[0].mxu1 %v1881_v35  ;;  %1797 = vmatpush3.bf16.msra.mxu0 %v1884_v37 }
  0x38   : > { %795 = vmatprep.mubr.bf16.mxu0 %v1885_v38  ;;  %892 = vmatprep.mubr.bf16.mxu1 %v1887_v39 }
  0x39   : > { %1824 = vmatpush3.bf16.msra.mxu1 %v1884_v37  ;;  %1798 = vmatprep.subr.bf16.mxu0 %v1897_v43 }
  0x3a   : > { %1821 = vmatprep.subr.bf16.mxu1 %v1897_v43 }
  0x3b   : > { %1799 = vmatpush3.bf16.msra.mxu0 %v1897_v43 }
  0x3c   : > { %1800 = vmatprep.subr.bf16.mxu0 %v1910_v47 }
  0x3d   : > { %1825 = vmatpush3.bf16.msra.mxu1 %v1897_v43 }
  0x3e   : > { %796 = vmatmul.mubr.bf16.gmra.mrb[4].mxu0 %v1889_v40  ;;  %1822 = vmatprep.subr.bf16.mxu1 %v1910_v47 }
  0x3f   : > { %893 = vmatmul.mubr.bf16.gmra.mrb[4].mxu1 %v1890_v41  ;;  %803 = vmatprep.mubr.bf16.mxu0 %v1891_v42 }
  0x40   : > { %900 = vmatprep.mubr.bf16.mxu1 %v1893_v44  ;;  %1801 = vmatpush3.bf16.msra.mxu0 %v1910_v47 }
  0x41   : > { %1826 = vmatpush3.bf16.msra.mxu1 %v1910_v47  ;;  %1802 = vmatprep.subr.bf16.mxu0 %v1923_v50 }
  0x42   : > { %1823 = vmatprep.subr.bf16.mxu1 %v1923_v50 }
  0x44   : > { %1803 = vmatpush3.bf16.msra.mxu0 %v1923_v50 }
  0x45   : > { %1827 = vmatpush3.bf16.msra.mxu1 %v1923_v50 }
  0x46   : > { %804 = vmatmul.mubr.bf16.gmra.mrb[8].mxu0 %v1895_v45 }
  0x47   : > { %901 = vmatmul.mubr.bf16.gmra.mrb[8].mxu1 %v1896_v46  ;;  %811 = vmatprep.mubr.bf16.mxu0 %v1898_v48 }
  0x48   : > { %908 = vmatprep.mubr.bf16.mxu1 %v1900_v49 }
  0x4e   : > { %812 = vmatmul.mubr.bf16.gmra.mrb[12].mxu0 %v1902_v51 }
  0x4f   : > { %909 = vmatmul.mubr.bf16.gmra.mrb[12].mxu1 %v1903_v52  ;;  %819 = vmatprep.mubr.bf16.mxu0 %v1904_v53 }
  0x50   : > { %916 = vmatprep.mubr.bf16.mxu1 %v1906_v54 }
  0x56   : > { %820 = vmatmul.mubr.bf16.gmra.mrb[16].mxu0 %v1908_v55 }
  0x57   : > { %917 = vmatmul.mubr.bf16.gmra.mrb[16].mxu1 %v1909_v56  ;;  %827 = vmatprep.mubr.bf16.mxu0 %v1911_v57 }
  0x58   : > { %924 = vmatprep.mubr.bf16.mxu1 %v1913_v58 }
  0x5e   : > { %828 = vmatmul.mubr.bf16.gmra.mrb[20].mxu0 %v1915_v59 }
  0x5f   : > { %925 = vmatmul.mubr.bf16.gmra.mrb[20].mxu1 %v1916_v60  ;;  %835 = vmatprep.mubr.bf16.mxu0 %v1917_v61 }
  0x60   : > { %932 = vmatprep.mubr.bf16.mxu1 %v1919_v62 }
  0x66   : > { %836 = vmatmul.mubr.bf16.gmra.mrb[24].mxu0 %v1921_v63 }
  0x67   : > { %933 = vmatmul.mubr.bf16.gmra.mrb[24].mxu1 %v1922_v0  ;;  %843 = vmatprep.mubr.bf16.mxu0 %v1924_v1 }
  0x68   : > { %940 = vmatprep.mubr.bf16.mxu1 %v1926_v2 }
  0x6e   : > { %844 = vmatmul.mubr.bf16.gmra.mrb[28].mxu0 %v1928_v3 }
  0x6f   : > { %941 = vmatmul.mubr.bf16.gmra.mrb[28].mxu1 %v1929_v4  ;;  %1804 = vmatprep.mubr.msk.bf16.mxu0 %vm730_vm1, %v1930_v5 }
  0x70   : > { %1812 = vmatprep.mubr.msk.bf16.mxu1 %vm730_vm1, %v1931_v6 }
  0x76   : > { %1805 = vmatmul.mubr.msk.bf16.vlgmr.msra.gmra.mrb[32].mxu0 %vm730_vm1, %v1932_v7 }
  0x77   : > { %1813 = vmatmul.mubr.msk.bf16.vlgmr.msra.gmra.mrb[32].mxu1 %vm730_vm1, %v1933_v8  ;;  %1808 = vmatprep.mubr.msk.bf16.mxu0 %vm730_vm1, %v1934_v9 }
  0x78   : > { %1816 = vmatprep.mubr.msk.bf16.mxu1 %vm730_vm1, %v1935_v10 }
  0x7e   : > { %1809 = vmatmul.mubr.msk.bf16.gmra.mrb[36].mxu0 %vm730_vm1, %v1936_v11 }
  0x7f   : > { %1817 = vmatmul.mubr.msk.bf16.gmra.mrb[36].mxu1 %vm730_vm1, %v1937_v12 }
 0x109   : > { %v1672_v13 = vpop.f32.mrb[0].mxu0 }
 0x10a   : > { %v1736_v14 = vpop.f32.mrb[0].mxu1  ;;  %v1673_v15 = vpop.f32.mrb[1].mxu0 }
 0x10b   : > { %v1674_v16 = vadd.f32 %v1673_v15, %v1672_v13  ;;  %v1737_v17 = vpop.f32.mrb[1].mxu1  ;;  %v1675_v18 = vpop.f32.mrb[2].mxu0 }
 0x10c   : > { %v1738_v19 = vadd.f32 %v1737_v17, %v1736_v14  ;;  %v1739_v20 = vpop.f32.mrb[2].mxu1  ;;  %v1676_v21 = vpop.f32.mrb[3].mxu0 }
 0x10d   : > { %v1677_v22 = vadd.f32 %v1676_v21, %v1675_v18  ;;  %v1740_v23 = vpop.f32.mrb[3].mxu1 }
 0x10e   : > { %v1741_v24 = vadd.f32 %v1740_v23, %v1739_v20  ;;  %v2155_v25 = vadd.f32 %v1738_v19, %v1674_v16 }
 0x110   : > { %v2157_v26 = vadd.f32 %v1741_v24, %v1677_v22 }
 0x111   : > { %v1678_v27 = vpop.f32.mrb[4].mxu0 }
 0x112   : > { %v1742_v28 = vpop.f32.mrb[4].mxu1  ;;  %v1679_v29 = vpop.f32.mrb[5].mxu0 }
 0x113   : > { %v1680_v30 = vadd.f32 %v1679_v29, %v1678_v27  ;;  %v1743_v31 = vpop.f32.mrb[5].mxu1  ;;  %v1681_v32 = vpop.f32.mrb[6].mxu0 }
 0x114   : > { %v1744_v33 = vadd.f32 %v1743_v31, %v1742_v28  ;;  %v1745_v34 = vpop.f32.mrb[6].mxu1  ;;  %v1682_v35 = vpop.f32.mrb[7].mxu0 }
 0x115   : > { %v1683_v36 = vadd.f32 %v1682_v35, %v1681_v32  ;;  %v1746_v37 = vpop.f32.mrb[7].mxu1 }
 0x116   : > { %v1747_v38 = vadd.f32 %v1746_v37, %v1745_v34  ;;  %v2159_v39 = vadd.f32 %v1744_v33, %v1680_v30 }
 0x118   : > { %v2161_v40 = vadd.f32 %v1747_v38, %v1683_v36 }
 0x119   : > { %v1684_v41 = vpop.f32.mrb[8].mxu0 }
 0x11a   : > { %v1748_v42 = vpop.f32.mrb[8].mxu1  ;;  %v1685_v43 = vpop.f32.mrb[9].mxu0 }
 0x11b   : > { %v1686_v44 = vadd.f32 %v1685_v43, %v1684_v41  ;;  %v1749_v45 = vpop.f32.mrb[9].mxu1  ;;  %v1687_v46 = vpop.f32.mrb[10].mxu0 }
 0x11c   : > { %v1750_v47 = vadd.f32 %v1749_v45, %v1748_v42  ;;  %v1751_v48 = vpop.f32.mrb[10].mxu1  ;;  %v1688_v49 = vpop.f32.mrb[11].mxu0 }
 0x11d   : > { %v1689_v50 = vadd.f32 %v1688_v49, %v1687_v46  ;;  %v1752_v51 = vpop.f32.mrb[11].mxu1 }
 0x11e   : > { %v1753_v52 = vadd.f32 %v1752_v51, %v1751_v48  ;;  %v2163_v53 = vadd.f32 %v1750_v47, %v1686_v44 }
 0x120   : > { %v2165_v54 = vadd.f32 %v1753_v52, %v1689_v50 }
 0x121   : > { %v1690_v55 = vpop.f32.mrb[12].mxu0 }
 0x122   : > { %v1754_v56 = vpop.f32.mrb[12].mxu1  ;;  %v1691_v57 = vpop.f32.mrb[13].mxu0 }
 0x123   : > { %v1692_v58 = vadd.f32 %v1691_v57, %v1690_v55  ;;  %v1755_v59 = vpop.f32.mrb[13].mxu1  ;;  %v1693_v60 = vpop.f32.mrb[14].mxu0 }
 0x124   : > { %v1756_v61 = vadd.f32 %v1755_v59, %v1754_v56  ;;  %v1757_v62 = vpop.f32.mrb[14].mxu1  ;;  %v1694_v63 = vpop.f32.mrb[15].mxu0 }
 0x125   : > { %v1695_v0 = vadd.f32 %v1694_v63, %v1693_v60  ;;  %v1758_v1 = vpop.f32.mrb[15].mxu1 }
 0x126   : > { %v1759_v2 = vadd.f32 %v1758_v1, %v1757_v62  ;;  %v2167_v3 = vadd.f32 %v1756_v61, %v1692_v58 }
 0x128   : > { %v2169_v4 = vadd.f32 %v1759_v2, %v1695_v0 }
 0x129   : > { %v1696_v5 = vpop.f32.mrb[16].mxu0 }
 0x12a   : > { %v1760_v6 = vpop.f32.mrb[16].mxu1  ;;  %v1697_v7 = vpop.f32.mrb[17].mxu0 }
 0x12b   : > { %v1698_v8 = vadd.f32 %v1697_v7, %v1696_v5  ;;  %v1761_v9 = vpop.f32.mrb[17].mxu1  ;;  %v1699_v10 = vpop.f32.mrb[18].mxu0 }
 0x12c   : > { %v1762_v11 = vadd.f32 %v1761_v9, %v1760_v6  ;;  %v1763_v12 = vpop.f32.mrb[18].mxu1  ;;  %v1700_v13 = vpop.f32.mrb[19].mxu0 }
 0x12d   : > { %v1701_v14 = vadd.f32 %v1700_v13, %v1699_v10  ;;  %v1764_v15 = vpop.f32.mrb[19].mxu1 }
 0x12e   : > { %v1765_v16 = vadd.f32 %v1764_v15, %v1763_v12  ;;  %v919_v17 = vadd.f32 %v1762_v11, %v1698_v8 }
 0x130   : > { %v2171_v18 = vadd.f32 %v1765_v16, %v1701_v14 }
 0x131   : > { %v1702_v19 = vpop.f32.mrb[20].mxu0 }
 0x132   : > { %v1766_v20 = vpop.f32.mrb[20].mxu1  ;;  %v1703_v21 = vpop.f32.mrb[21].mxu0 }
 0x133   : > { %v1704_v22 = vadd.f32 %v1703_v21, %v1702_v19  ;;  %v1767_v23 = vpop.f32.mrb[21].mxu1  ;;  %v1705_v24 = vpop.f32.mrb[22].mxu0 }
 0x134   : > { %v1768_v27 = vadd.f32 %v1767_v23, %v1766_v20  ;;  %v1769_v28 = vpop.f32.mrb[22].mxu1  ;;  %v1706_v29 = vpop.f32.mrb[23].mxu0 }
 0x135   : > { %v1707_v30 = vadd.f32 %v1706_v29, %v1705_v24  ;;  %v1770_v31 = vpop.f32.mrb[23].mxu1 }
 0x136   : > { %v1771_v32 = vadd.f32 %v1770_v31, %v1769_v28  ;;  %v927_v33 = vadd.f32 %v1768_v27, %v1704_v22 }
 0x138   : > { %v930_v34 = vadd.f32 %v1771_v32, %v1707_v30 }
 0x139   : > { %v1708_v35 = vpop.f32.mrb[24].mxu0 }
 0x13a   : > { %v1772_v36 = vpop.f32.mrb[24].mxu1  ;;  %v1709_v37 = vpop.f32.mrb[25].mxu0 }
 0x13b   : > { %v1710_v38 = vadd.f32 %v1709_v37, %v1708_v35  ;;  %v1773_v41 = vpop.f32.mrb[25].mxu1  ;;  %v1711_v42 = vpop.f32.mrb[26].mxu0 }
 0x13c   : > { %v1774_v43 = vadd.f32 %v1773_v41, %v1772_v36  ;;  %v1775_v44 = vpop.f32.mrb[26].mxu1  ;;  %v1712_v45 = vpop.f32.mrb[27].mxu0 }
 0x13d   : > { %v1713_v46 = vadd.f32 %v1712_v45, %v1711_v42  ;;  %v1776_v47 = vpop.f32.mrb[27].mxu1 }
 0x13e   : > { %v1777_v48 = vadd.f32 %v1776_v47, %v1775_v44  ;;  %v2173_v49 = vadd.f32 %v1774_v43, %v1710_v38 }
 0x140   : > { %v2175_v50 = vadd.f32 %v1777_v48, %v1713_v46 }
 0x141   : > { %v1714_v51 = vpop.f32.mrb[28].mxu0 }
 0x142   : > { %v1778_v52 = vpop.f32.mrb[28].mxu1  ;;  %v1715_v55 = vpop.f32.mrb[29].mxu0 }
 0x143   : > { %v1716_v56 = vadd.f32 %v1715_v55, %v1714_v51  ;;  %v1779_v57 = vpop.f32.mrb[29].mxu1  ;;  %v1717_v58 = vpop.f32.mrb[30].mxu0 }
 0x144   : > { %v1780_v59 = vadd.f32 %v1779_v57, %v1778_v52  ;;  %v1781_v60 = vpop.f32.mrb[30].mxu1  ;;  %v1718_v61 = vpop.f32.mrb[31].mxu0 }
 0x145   : > { %v1719_v62 = vadd.f32 %v1718_v61, %v1717_v58  ;;  %v1782_v63 = vpop.f32.mrb[31].mxu1 }
 0x146   : > { %v1783_v0 = vadd.f32 %v1782_v63, %v1781_v60  ;;  %v943_v1 = vadd.f32 %v1780_v59, %v1716_v56 }
 0x148   : > { %v2178_v2 = vadd.f32 %v1783_v0, %v1719_v62 }
 0x149   : > { %v1806_v5 = vpop.f32.mrb[32].mxu0 }
 0x14a   : > { %v992_v6 = vadd.f32 %v1806_v5, %v2159_v39  ;;  %v1814_v7 = vpop.f32.mrb[32].mxu1  ;;  %v983_v8 = vpop.f32.mrb[33].mxu0 }
 0x14b   : > { %v2186_v9 = vadd.f32 %v1814_v7, %v927_v33  ;;  %v984_v10 = vadd.f32 %v983_v8, %v2155_v25  ;;  %v1015_v11 = vpop.f32.mrb[33].mxu1  ;;  %v1807_v12 = vpop.f32.mrb[34].mxu0 }
 0x14c   : > { %v1587_v13 = vpack.c.bf16 %v992_v6, %v992_v6  ;;  %v2189_v39 = vadd.f32 %v1015_v11, %v919_v17  ;;  %v1815_v14 = vpop.f32.mrb[34].mxu1  ;;  %v986_v15 = vpop.f32.mrb[35].mxu0  ;;  %v995_v21 = vadd.f32 %v1807_v12, %v2161_v40  ;;  %v1090_v33 = vmul.f32 %v992_v6, %v992_v6 }
 0x14d   : > { %v1595_v16 = vpack.c.bf16 %v2186_v9, %v2186_v9  ;;  %v1018_v19 = vpop.f32.mrb[35].mxu1  ;;  %v1585_v20 = vpack.c.bf16 %v984_v10, %v984_v10  ;;  %v1088_v22 = vmul.f32 %v984_v10, %v984_v10  ;;  %v2202_v17 = vadd.f32 %v1815_v14, %v930_v34 }
 0x14e   : > { %1215 = vst.msk [vmem:[%s2184_s29 + $0x8] sm:$0xf] %vm1212_vm2, %v1587_v13  ;;  %v1593_v25 = vpack.c.bf16 %v2189_v39, %v2189_v39  ;;  %v987_v23 = vadd.f32 %v986_v15, %v2157_v26  ;;  %v2206_v24 = vadd.f32 %v1018_v19, %v2171_v18  ;;  %v1588_v27 = vpack.c.bf16 %v995_v21, %v995_v21 }
 0x14f   : > { %1223 = vst.msk [vmem:[%s2184_s29 + $0x28] sm:$0xf] %vm1212_vm2, %v1595_v16  ;;  %1213 = vst.msk [vmem:[%s2184_s29] sm:$0xf] %vm1212_vm2, %v1585_v20  ;;  %v1047_v29 = vsel %vm730_vm1, %v984_v10, 0.0  ;;  %v1596_v40 = vpack.c.bf16 %v2202_v17, %v2202_v17  ;;  %v1050_v37 = vsel %vm730_vm1, %v992_v6, 0.0  ;;  %v1091_v41 = vmul.f32 %v995_v21, %v995_v21 }
 0x150   : > { %1221 = vst.msk [vmem:[%s2184_s29 + $0x20] sm:$0xf] %vm1212_vm2, %v1593_v25  ;;  %v1048_v30 = vsel %vm730_vm1, %v987_v23, 0.0  ;;  %1216 = vst.msk [vmem:[%s2184_s29 + $0xc] sm:$0xf] %vm1212_vm2, %v1588_v27  ;;  %v1089_v18 = vmul.f32 %v987_v23, %v987_v23  ;;  %v1586_v34 = vpack.c.bf16 %v987_v23, %v987_v23  ;;  %v1104_v38 = vsel %vm730_vm1, %v1088_v22, 0.0 }
 0x151   : > { %v1810_v28 = vpop.f32.mrb[36].mxu0  ;;  %v1049_v26 = vadd.f32 %v1048_v30, %v1047_v29  ;;  %1224 = vst.msk [vmem:[%s2184_s29 + $0x2c] sm:$0xf] %vm1212_vm2, %v1596_v40  ;;  %v1594_v42 = vpack.c.bf16 %v2206_v24, %v2206_v24  ;;  %v1107_v57 = vsel %vm730_vm1, %v1090_v33, 0.0  ;;  %v1052_v58 = vsel %vm730_vm1, %v995_v21, 0.0 }
 0x152   : > { %v1818_v31 = vpop.f32.mrb[36].mxu1  ;;  %v999_v32 = vpop.f32.mrb[37].mxu0  ;;  %v1105_v46 = vsel %vm730_vm1, %v1089_v18, 0.0  ;;  %1214 = vst.msk [vmem:[%s2184_s29 + $0x4] sm:$0xf] %vm1212_vm2, %v1586_v34  ;;  %v1008_v47 = vadd.f32 %v1810_v28, %v2167_v3  ;;  %v1109_v62 = vsel %vm730_vm1, %v1091_v41, 0.0  ;;  %v1096_v27 = vmul.f32 %v2189_v39, %v2189_v39 }
 0x153   : > { %v1031_v35 = vpop.f32.mrb[37].mxu1  ;;  %v1811_v36 = vpop.f32.mrb[38].mxu0  ;;  %v1051_v45 = vadd.f32 %v1050_v37, %v1049_v26  ;;  %v2226_v48 = vadd.f32 %v1818_v31, %v943_v1  ;;  %v1106_v52 = vadd.f32 %v1105_v46, %v1104_v38  ;;  %1222 = vst.msk [vmem:[%s2184_s29 + $0x24] sm:$0xf] %vm1212_vm2, %v1594_v42  ;;  %v1000_v55 = vadd.f32 %v999_v32, %v2163_v53 }
 0x154   : > { %v1819_v43 = vpop.f32.mrb[38].mxu1  ;;  %v1002_v44 = vpop.f32.mrb[39].mxu0  ;;  %v2232_v56 = vadd.f32 %v1031_v35, %v2173_v49  ;;  %v1591_v59 = vpack.c.bf16 %v1008_v47, %v1008_v47  ;;  %v1011_v7 = vadd.f32 %v1811_v36, %v2169_v4  ;;  %v1094_v16 = vmul.f32 %v1008_v47, %v1008_v47 }
 0x155   : > { %v1034_v51 = vpop.f32.mrb[39].mxu1  ;;  %v1108_v60 = vadd.f32 %v1107_v57, %v1106_v52  ;;  %v1599_v3 = vpack.c.bf16 %v2226_v48, %v2226_v48  ;;  %v1053_v61 = vadd.f32 %v1052_v58, %v1051_v45  ;;  %v1054_v53 = vsel %vm730_vm1, %v1000_v55, 0.0 }
 0x156   : > { %1219 = vst.msk [vmem:[%s2184_s29 + $0x18] sm:$0xf] %vm1212_vm2, %v1591_v59  ;;  %v1092_v49 = vmul.f32 %v1000_v55, %v1000_v55  ;;  %v1589_v63 = vpack.c.bf16 %v1000_v55, %v1000_v55  ;;  %v1597_v6 = vpack.c.bf16 %v2232_v56, %v2232_v56  ;;  %v1043_v10 = vadd.f32 %v1819_v43, %v2178_v2 }
 0x157   : > { %1227 = vst.msk [vmem:[%s2184_s29 + $0x38] sm:$0xf] %vm1212_vm2, %v1599_v3  ;;  %v1055_v0 = vadd.f32 %v1054_v53, %v1053_v61  ;;  %v1110_v1 = vadd.f32 %v1109_v62, %v1108_v60  ;;  %v1003_v11 = vadd.f32 %v1002_v44, %v2165_v54  ;;  %v1035_v12 = vadd.f32 %v1034_v51, %v2175_v50 }
 0x158   : > { %v1111_v5 = vsel %vm730_vm1, %v1092_v49, 0.0  ;;  %1217 = vst.msk [vmem:[%s2184_s29 + $0x10] sm:$0xf] %vm1212_vm2, %v1589_v63  ;;  %1225 = vst.msk [vmem:[%s2184_s29 + $0x30] sm:$0xf] %vm1212_vm2, %v1597_v6  ;;  %v1592_v13 = vpack.c.bf16 %v1011_v7, %v1011_v7  ;;  %v1600_v14 = vpack.c.bf16 %v1043_v10, %v1043_v10  ;;  %v1058_v2 = vsel %vm730_vm1, %v1008_v47, 0.0 }
 0x159   : > { %v1112_v8 = vadd.f32 %v1111_v5, %v1110_v1  ;;  %v1056_v15 = vsel %vm730_vm1, %v1003_v11, 0.0  ;;  %v1093_v4 = vmul.f32 %v1003_v11, %v1003_v11  ;;  %v1590_v20 = vpack.c.bf16 %v1003_v11, %v1003_v11 }
 0x15a   : > { %1220 = vst.msk [vmem:[%s2184_s29 + $0x1c] sm:$0xf] %vm1212_vm2, %v1592_v13  ;;  %v1057_v19 = vadd.f32 %v1056_v15, %v1055_v0  ;;  %1228 = vst.msk [vmem:[%s2184_s29 + $0x3c] sm:$0xf] %vm1212_vm2, %v1600_v14  ;;  %v1598_v54 = vpack.c.bf16 %v1035_v12, %v1035_v12  ;;  %v1095_v50 = vmul.f32 %v1011_v7, %v1011_v7  ;;  %v1060_v22 = vsel %vm730_vm1, %v1011_v7, 0.0 }
 0x15b   : > { %v1113_v21 = vsel %vm730_vm1, %v1093_v4, 0.0  ;;  %1218 = vst.msk [vmem:[%s2184_s29 + $0x14] sm:$0xf] %vm1212_vm2, %v1590_v20  ;;  %v1115_v28 = vsel %vm730_vm1, %v1094_v16, 0.0  ;;  %v1062_v40 = vsel %vm730_vm1, %v2189_v39, 0.0  ;;  %v1097_v31 = vmul.f32 %v2206_v24, %v2206_v24 }
 0x15c   : > { %v1059_v25 = vadd.f32 %v1058_v2, %v1057_v19  ;;  %v1114_v23 = vadd.f32 %v1113_v21, %v1112_v8  ;;  %1226 = vst.msk [vmem:[%s2184_s29 + $0x34] sm:$0xf] %vm1212_vm2, %v1598_v54  ;;  %v1117_v32 = vsel %vm730_vm1, %v1095_v50, 0.0  ;;  %v1064_v26 = vsel %vm730_vm1, %v2206_v24, 0.0  ;;  %v1046_v19 = vld [vmem:[#allocation2] sm:$0x1] }
 0x15d   : > { %v1098_v34 = vmul.f32 %v2186_v9, %v2186_v9  ;;  %v1119_v35 = vsel %vm730_vm1, %v1096_v27, 0.0  ;;  %v1066_v39 = vsel %vm730_vm1, %v2186_v9, 0.0  ;;  %v1099_v38 = vmul.f32 %v2202_v17, %v2202_v17  ;;  %v1087_v54 = vld [vmem:[#allocation3] sm:$0x1] }
 0x15e   : > { %v1061_v29 = vadd.f32 %v1060_v22, %v1059_v25  ;;  %v1116_v30 = vadd.f32 %v1115_v28, %v1114_v23  ;;  %v1121_v41 = vsel %vm730_vm1, %v1097_v31, 0.0  ;;  %v1068_v24 = vsel %vm730_vm1, %v2202_v17, 0.0 }
 0x15f   : > { %v1123_v44 = vsel %vm730_vm1, %v1098_v34, 0.0  ;;  %v1100_v45 = vmul.f32 %v2232_v56, %v2232_v56  ;;  %v1070_v9 = vsel %vm730_vm1, %v2232_v56, 0.0  ;;  %v1125_v51 = vsel %vm730_vm1, %v1099_v38, 0.0 }
 0x160   : > { %v1063_v33 = vadd.f32 %v1062_v40, %v1061_v29  ;;  %v1118_v18 = vadd.f32 %v1117_v32, %v1116_v30  ;;  %v1101_v55 = vmul.f32 %v1035_v12, %v1035_v12  ;;  %v1072_v57 = vsel %vm730_vm1, %v1035_v12, 0.0  ;;  %v1249_v30 = vld [vmem:[%s2393_s2] sm:$0x1] (!%p1564_p5) }
 0x161   : > { %v1102_v17 = vmul.f32 %v2226_v48, %v2226_v48  ;;  %v1127_v59 = vsel %vm730_vm1, %v1100_v45, 0.0  ;;  %v1074_v3 = vsel %vm730_vm1, %v2226_v48, 0.0  ;;  %v1103_v62 = vmul.f32 %v1043_v10, %v1043_v10 }
 0x162   : > { %v1065_v36 = vadd.f32 %v1064_v26, %v1063_v33  ;;  %v1120_v37 = vadd.f32 %v1119_v35, %v1118_v18  ;;  %v1129_v53 = vsel %vm730_vm1, %v1101_v55, 0.0  ;;  %v1076_v49 = vsel %vm730_vm1, %v1043_v10, 0.0 }
 0x163   : > { %v1131_v0 = vsel %vm730_vm1, %v1102_v17, 0.0  ;;  %v1133_v6 = vsel %vm730_vm1, %v1103_v62, 0.0 }
 0x164   : > { %v1067_v42 = vadd.f32 %v1066_v39, %v1065_v36  ;;  %v1122_v43 = vadd.f32 %v1121_v41, %v1120_v37 }
 0x166   : > { %v1069_v46 = vadd.f32 %v1068_v24, %v1067_v42  ;;  %v1124_v47 = vadd.f32 %v1123_v44, %v1122_v43 }
 0x168   : > { %v1071_v52 = vadd.f32 %v1070_v9, %v1069_v46  ;;  %v1126_v58 = vadd.f32 %v1125_v51, %v1124_v47 }
 0x16a   : > { %v1073_v60 = vadd.f32 %v1072_v57, %v1071_v52  ;;  %v1128_v61 = vadd.f32 %v1127_v59, %v1126_v58 }
 0x16c   : > { %v1075_v56 = vadd.f32 %v1074_v3, %v1073_v60  ;;  %v1130_v63 = vadd.f32 %v1129_v53, %v1128_v61 }
 0x16e   : > { %v1077_v1 = vadd.f32 %v1076_v49, %v1075_v56  ;;  %v1132_v5 = vadd.f32 %v1131_v0, %v1130_v63 }
 0x170   : > { %v1078_v7 = vrot.slane %v1077_v1, 4  ;;  %v1134_v8 = vadd.f32 %v1133_v6, %v1132_v5 }
 0x172   : > { %v1079_v11 = vadd.f32 %v1078_v7, %v1077_v1  ;;  %v1135_v12 = vrot.slane %v1134_v8, 4 }
 0x174   : > { %v1080_v13 = vrot.slane %v1079_v11, 2  ;;  %v1136_v48 = vadd.f32 %v1135_v12, %v1134_v8 }
 0x176   : > { %v1081_v14 = vadd.f32 %v1080_v13, %v1079_v11  ;;  %v1137_v15 = vrot.slane %v1136_v48, 2 }
 0x178   : > { %v1082_v16 = vrot.slane %v1081_v14, 1  ;;  %v1138_v4 = vadd.f32 %v1137_v15, %v1136_v48 }
 0x17a   : > { %v1083_v20 = vadd.f32 %v1082_v16, %v1081_v14  ;;  %v1139_v10 = vrot.slane %v1138_v4, 1  ;;  %1232 = sbr.rel (%p1564_p5) target bundleno = 439 (0x1b7), region = 40 }
 0x17c   : > { %v1084_v2 = vadd.f32 %v1083_v20, %v1046_v19  ;;  %v1140_v50 = vadd.f32 %v1139_v10, %v1138_v4 }
 0x17e   : > { %1086 = vst.msk [vmem:[#allocation2] sm:$0x1] %vm1085_vm3, %v1084_v2  ;;  %v1141_v25 = vadd.f32 %v1140_v50, %v1087_v54 }
 0x180   : > { %1142 = vst.msk [vmem:[#allocation3] sm:$0x1] %vm1085_vm3, %v1141_v25 }
 0x185   : > { %v1233_v21 = vld [vmem:[#allocation2] sm:$0x1] }
 0x186   : > { %v1234_v23 = vmul.f32 0.001953125, %v1233_v21 }
 0x187   : > { %v1235_v22 = vld [vmem:[#allocation3] sm:$0x1] }
 0x188   : > { %v1236_v27 = vmul.f32 0.001953125, %v1235_v22  ;;  %v1237_v28 = vmul.f32 %v1234_v23, %v1234_v23 }
 0x18a   : > { %v1238_v29 = vsub.f32 %v1236_v27, %v1237_v28 }
 0x18c   : > { %v1239_v40 = vadd.f32 1e-05, %v1238_v29 }
 0x18e   : > { %1938 = vrsqrt.f32 %v1239_v40  ;;  %vm1242_vm4 = vcmp.eq.f32.partialorder %v1239_v40, inf  ;;  %v1245_v32 = vand.u32 2147483648, %v1239_v40  ;;  %vm1244_vm5 = vcmp.eq.f32.partialorder %v1239_v40, 0.0 }
 0x198   : > { %v1939_v31 = vpop.eup %1938 }
 0x199   : > { %v1241_v33 = vmul.f32 %v1939_v31, %v1239_v40  ;;  %v2309_v26 = vmul.f32 %v1939_v31, %v1249_v30 }
 0x19b   : > { %v1243_v18 = vsel %vm1242_vm4, %v1239_v40, %v1241_v33 }
 0x19c   : > { %v1246_v34 = vsel %vm1244_vm5, %v1245_v32, %v1243_v18 }
 0x19d   : > { %1247 = vst.msk [vmem:[%s2395_s4] sm:$0x1] %vm1085_vm3, %v1246_v34 }
 0x19e LB: >> { %v1295_v35 = vlaneseq  ;;  %s1565_s8 = sshll.u32 %s1954_s7, 7  ;;  %s1256_s7 = sadd.s32 1, %s1954_s7   ;;  %s1954_s7 = sphi %s2315_s7, %s1256_s7  }
 0x19f   : >> { %s1258_s9 = sshra.s32 %s1565_s8, 3  ;;  %p1253_p6 = scmp.ge.s32.totalorder %s1256_s7, 4  }
 0x1a0   : >> { %v1296_v36 = vshrl.u32 %v1295_v35, 7  ;;  %s1566_s10 = sshll.u32 %s1258_s9, 2 }
 0x1a1   : >> { %s2324_s13 = scalar_lea.vmem %s2394_s3, %s1566_s10 }
 0x1a2   : >> { %v1297_v39 = vsub.s32 0, %v1296_v36  ;;  %v1618_v37 = vld [vmem:[%s2324_s13] sm:$0xff]   ;;  %v1649_v41 = vld [vmem:[%s2324_s13 + $0x8] sm:$0xff]   ;;  %v1650_v42 = vld [vmem:[%s2324_s13 + $0x10] sm:$0xff]  }
 0x1a3   : >> { %v1619_v24 = vunpack.c.l.bf16 %v1618_v37  ;;  %v1620_v43 = vunpack.c.h.bf16 %v1618_v37  ;;  %v1623_v44 = vunpack.c.l.bf16 %v1649_v41  ;;  %v1624_v45 = vunpack.c.h.bf16 %v1649_v41  ;;  %v1651_v46 = vld [vmem:[%s2324_s13 + $0x18] sm:$0xff]   ;;  %v1652_v6 = vld [vmem:[%s2324_s13 + $0x20] sm:$0xff]   ;;  %v1653_v7 = vld [vmem:[%s2324_s13 + $0x28] sm:$0xff]  }
 0x1a4   : >> { %v2328_v38 = vrot.slane %v2309_v26, %v1297_v39  ;;  %v1627_v9 = vunpack.c.l.bf16 %v1650_v42  ;;  %v1628_v47 = vunpack.c.h.bf16 %v1650_v42  ;;  %v1631_v51 = vunpack.c.l.bf16 %v1651_v46  ;;  %v1654_v48 = vld [vmem:[%s2324_s13 + $0x30] sm:$0xff]   ;;  %v1655_v14 = vld [vmem:[%s2324_s13 + $0x38] sm:$0xff]  }
 0x1a5   : >> { %v1632_v52 = vunpack.c.h.bf16 %v1651_v46  ;;  %v1635_v20 = vunpack.c.l.bf16 %v1652_v6  ;;  %v1636_v10 = vunpack.c.h.bf16 %v1652_v6  ;;  %v1639_v2 = vunpack.c.l.bf16 %v1653_v7 }
 0x1a6   : >> { %v1300_v55 = vmul.f32 %v1619_v24, %v2328_v38  ;;  %v1301_v57 = vmul.f32 %v1620_v43, %v2328_v38  ;;  %v1302_v58 = vmul.f32 %v1623_v44, %v2328_v38  ;;  %v1303_v17 = vmul.f32 %v1624_v45, %v2328_v38 }
 0x1a7   : >> { %v1304_v59 = vmul.f32 %v1627_v9, %v2328_v38  ;;  %v1305_v60 = vmul.f32 %v1628_v47, %v2328_v38  ;;  %v1306_v3 = vmul.f32 %v1631_v51, %v2328_v38  ;;  %v1307_v61 = vmul.f32 %v1632_v52, %v2328_v38 }
 0x1a8   : >> { %v1316_v62 = vmax.f32 %v1300_v55, 0.0  ;;  %v1317_v56 = vmax.f32 %v1301_v57, 0.0  ;;  %v1318_v53 = vmax.f32 %v1302_v58, 0.0  ;;  %v1319_v49 = vmax.f32 %v1303_v17, 0.0 }
 0x1a9   : >> { %v1320_v63 = vmax.f32 %v1304_v59, 0.0  ;;  %v1321_v0 = vmax.f32 %v1305_v60, 0.0  ;;  %v1322_v1 = vmax.f32 %v1306_v3, 0.0  ;;  %v1323_v5 = vmax.f32 %v1307_v61, 0.0 }
 0x1aa   : >> { %v1601_v8 = vpack.c.bf16 %v1316_v62, %v1316_v62  ;;  %v1602_v11 = vpack.c.bf16 %v1317_v56, %v1317_v56  ;;  %v1603_v12 = vpack.c.bf16 %v1318_v53, %v1318_v53  ;;  %v1604_v13 = vpack.c.bf16 %v1319_v49, %v1319_v49 }
 0x1ab   : >> { %v1605_v15 = vpack.c.bf16 %v1320_v63, %v1320_v63  ;;  %v1606_v16 = vpack.c.bf16 %v1321_v0, %v1321_v0  ;;  %v1607_v19 = vpack.c.bf16 %v1322_v1, %v1322_v1  ;;  %v1608_v4 = vpack.c.bf16 %v1323_v5, %v1323_v5 }
 0x1ac   : >> { %1396 = vst.msk [vmem:[%s2324_s13] sm:$0xf] %vm1212_vm2, %v1601_v8  ;;  %1397 = vst.msk [vmem:[%s2324_s13 + $0x4] sm:$0xf] %vm1212_vm2, %v1602_v11  ;;  %v1640_v54 = vunpack.c.h.bf16 %v1653_v7  ;;  %v1643_v50 = vunpack.c.l.bf16 %v1654_v48  ;;  %v1644_v25 = vunpack.c.h.bf16 %v1654_v48  ;;  %v1647_v21 = vunpack.c.l.bf16 %v1655_v14 }
 0x1ad   : >> { %1398 = vst.msk [vmem:[%s2324_s13 + $0x8] sm:$0xf] %vm1212_vm2, %v1603_v12  ;;  %1399 = vst.msk [vmem:[%s2324_s13 + $0xc] sm:$0xf] %vm1212_vm2, %v1604_v13  ;;  %v1648_v22 = vunpack.c.h.bf16 %v1655_v14  ;;  %v1308_v23 = vmul.f32 %v1635_v20, %v2328_v38  ;;  %v1309_v27 = vmul.f32 %v1636_v10, %v2328_v38  ;;  %v1310_v28 = vmul.f32 %v1639_v2, %v2328_v38 }
 0x1ae   : >> { %1400 = vst.msk [vmem:[%s2324_s13 + $0x10] sm:$0xf] %vm1212_vm2, %v1605_v15  ;;  %1401 = vst.msk [vmem:[%s2324_s13 + $0x14] sm:$0xf] %vm1212_vm2, %v1606_v16  ;;  %v1311_v29 = vmul.f32 %v1640_v54, %v2328_v38  ;;  %v1312_v40 = vmul.f32 %v1643_v50, %v2328_v38  ;;  %v1313_v30 = vmul.f32 %v1644_v25, %v2328_v38 }
 0x1af   : >> { %1402 = vst.msk [vmem:[%s2324_s13 + $0x18] sm:$0xf] %vm1212_vm2, %v1607_v19  ;;  %1403 = vst.msk [vmem:[%s2324_s13 + $0x1c] sm:$0xf] %vm1212_vm2, %v1608_v4  ;;  %v1314_v31 = vmul.f32 %v1647_v21, %v2328_v38  ;;  %v1315_v32 = vmul.f32 %v1648_v22, %v2328_v38  ;;  %v1324_v33 = vmax.f32 %v1308_v23, 0.0  ;;  %v1325_v18 = vmax.f32 %v1309_v27, 0.0 }
 0x1b0   : >> { %v1326_v34 = vmax.f32 %v1310_v28, 0.0  ;;  %v1327_v35 = vmax.f32 %v1311_v29, 0.0  ;;  %v1328_v36 = vmax.f32 %v1312_v40, 0.0  ;;  %v1329_v39 = vmax.f32 %v1313_v30, 0.0  ;;  %1255 = sbr.rel (!%p1253_p6) target bundleno = 414 (0x19e), region = 83 }
 0x1b1   : >> { %v1330_v37 = vmax.f32 %v1314_v31, 0.0  ;;  %v1331_v41 = vmax.f32 %v1315_v32, 0.0  ;;  %v1609_v42 = vpack.c.bf16 %v1324_v33, %v1324_v33  ;;  %v1610_v24 = vpack.c.bf16 %v1325_v18, %v1325_v18 }
 0x1b2   : >> { %v1611_v43 = vpack.c.bf16 %v1326_v34, %v1326_v34  ;;  %v1612_v38 = vpack.c.bf16 %v1327_v35, %v1327_v35  ;;  %v1613_v44 = vpack.c.bf16 %v1328_v36, %v1328_v36  ;;  %v1614_v45 = vpack.c.bf16 %v1329_v39, %v1329_v39 }
 0x1b3   : >> { %v1615_v46 = vpack.c.bf16 %v1330_v37, %v1330_v37  ;;  %v1616_v9 = vpack.c.bf16 %v1331_v41, %v1331_v41  ;;  %1404 = vst.msk [vmem:[%s2324_s13 + $0x20] sm:$0xf] %vm1212_vm2, %v1609_v42  ;;  %1405 = vst.msk [vmem:[%s2324_s13 + $0x24] sm:$0xf] %vm1212_vm2, %v1610_v24 }
 0x1b4   : >> { %1406 = vst.msk [vmem:[%s2324_s13 + $0x28] sm:$0xf] %vm1212_vm2, %v1611_v43  ;;  %1407 = vst.msk [vmem:[%s2324_s13 + $0x2c] sm:$0xf] %vm1212_vm2, %v1612_v38 }
 0x1b5   : >> { %1408 = vst.msk [vmem:[%s2324_s13 + $0x30] sm:$0xf] %vm1212_vm2, %v1613_v44  ;;  %1409 = vst.msk [vmem:[%s2324_s13 + $0x34] sm:$0xf] %vm1212_vm2, %v1614_v45 }
 0x1b6   : >> { %1410 = vst.msk [vmem:[%s2324_s13 + $0x38] sm:$0xf] %vm1212_vm2, %v1615_v46  ;;  %1411 = vst.msk [vmem:[%s2324_s13 + $0x3c] sm:$0xf] %vm1212_vm2, %v1616_v9 }
 0x1b7 PF: > { %s15_s15 = sadd.s32 1, %s1950_s15  }
 0x1b8   : > { %p12_p7 = scmp.ge.s32.totalorder %s15_s15, 6  }
 0x1ba   :  { %14 = sbr.rel (!%p12_p7) target bundleno = 1 (0x1), region = 94 }

// kernel: _lambda_.11
= control target key start
LH: loop header
LB: loop body
LE: loop exit
PB: predicated region body
PF: predicated region fallthrough
CT: control target
= control target key end

     0   :  { %s1466_s9 = smov 0   ;;  %s1692_s0 = inlined_call_operand.vmem [shape: bf16[512,576], index: 0, kind: input, shape index: {}]   ;;  %s1693_s1 = inlined_call_operand.vmem [shape: bf16[576,128], index: 1, kind: input, shape index: {}]   ;;  %s1694_s2 = inlined_call_operand.vmem [shape: f32[512,128], index: 2, kind: output, shape index: {}]  }
   0x1 LB: > { %s1075_s10 = sadd.s32 4294967295, %s1449_s9   ;;  %p1079_p0 = scmp.ge.s32.totalorder %s1449_s9, 1  ;;  %s1449_s9 = sphi %s1466_s9, %s12_s9  }
   0x2   : > { %p114_p1 = scmp.lt.s32.totalorder %s1449_s9, 5 }
   0x4   : > { %p115_p2 = pnand %p1079_p0, %p114_p1 }
   0x5   : > { %v1351_v0 = vld [vmem:[%s1693_s1 + $0x40] sm:$0xff] (!%p115_p2)   ;;  %v1355_v4 = vld [vmem:[%s1693_s1 + $0x48] sm:$0xff] (!%p115_p2)   ;;  %v1359_v8 = vld [vmem:[%s1693_s1 + $0x50] sm:$0xff] (!%p115_p2)   ;;  %s1080_s15 = sshll.u32 (!%p115_p2), %s1075_s10, 4  ;;  %vm687_vm0 = vcmask (!%p115_p2), 523264  }
   0x6   : > { %118 = sbr.rel (%p115_p2) target bundleno = 330 (0x14a), region = 28  ;;  %v1352_v1 = vld [vmem:[%s1693_s1 + $0xc0] sm:$0xff] (!%p115_p2)   ;;  %1170 = vmatprep.subr.bf16.mxu0 (!%p115_p2), %v1351_v0  ;;  %v1356_v5 = vld [vmem:[%s1693_s1 + $0xc8] sm:$0xff] (!%p115_p2)   ;;  %v1360_v9 = vld [vmem:[%s1693_s1 + $0xd0] sm:$0xff] (!%p115_p2)   ;;  %p138_p3 = scmp.lt.s32.totalorder (!%p115_p2), %s1080_s15, 63 }
   0x7   : > { %v1353_v2 = vld [vmem:[%s1693_s1] sm:$0xff] (!%p115_p2)   ;;  %1234 = vmatprep.subr.bf16.mxu1 (!%p115_p2), %v1352_v1  ;;  %v1357_v6 = vld [vmem:[%s1693_s1 + $0x8] sm:$0xff] (!%p115_p2)   ;;  %v1361_v10 = vld [vmem:[%s1693_s1 + $0x10] sm:$0xff] (!%p115_p2)  }
   0x8   : > { %v1354_v3 = vld [vmem:[%s1693_s1 + $0x80] sm:$0xff] (!%p115_p2)   ;;  %1171 = vmatpush3.bf16.msra.mxu0 (!%p115_p2), %v1353_v2  ;;  %v1358_v7 = vld [vmem:[%s1693_s1 + $0x88] sm:$0xff] (!%p115_p2)   ;;  %v1362_v11 = vld [vmem:[%s1693_s1 + $0x90] sm:$0xff] (!%p115_p2)  }
   0x9   : > { %1235 = vmatpush3.bf16.msra.mxu1 (!%p115_p2), %v1354_v3  ;;  %1172 = vmatprep.subr.bf16.mxu0 (!%p115_p2), %v1355_v4  ;;  %v1363_v12 = vld [vmem:[%s1693_s1 + $0x58] sm:$0xff] (!%p115_p2)   ;;  %v1367_v16 = vld [vmem:[%s1693_s1 + $0x60] sm:$0xff] (!%p115_p2)   ;;  %v1371_v20 = vld [vmem:[%s1693_s1 + $0x68] sm:$0xff] (!%p115_p2)  }
   0xa   : > { %1236 = vmatprep.subr.bf16.mxu1 (!%p115_p2), %v1356_v5  ;;  %v1364_v13 = vld [vmem:[%s1693_s1 + $0xd8] sm:$0xff] (!%p115_p2)   ;;  %v1368_v17 = vld [vmem:[%s1693_s1 + $0xe0] sm:$0xff] (!%p115_p2)   ;;  %v1372_v21 = vld [vmem:[%s1693_s1 + $0xe8] sm:$0xff] (!%p115_p2)  }
   0xb   : > { %v1365_v14 = vld [vmem:[%s1693_s1 + $0x18] sm:$0xff] (!%p115_p2)   ;;  %v1369_v18 = vld [vmem:[%s1693_s1 + $0x20] sm:$0xff] (!%p115_p2)   ;;  %v1373_v22 = vld [vmem:[%s1693_s1 + $0x28] sm:$0xff] (!%p115_p2)  }
   0xc   : > { %1173 = vmatpush3.bf16.msra.mxu0 (!%p115_p2), %v1357_v6  ;;  %v1366_v15 = vld [vmem:[%s1693_s1 + $0x98] sm:$0xff] (!%p115_p2)   ;;  %v1370_v19 = vld [vmem:[%s1693_s1 + $0xa0] sm:$0xff] (!%p115_p2)   ;;  %v1374_v23 = vld [vmem:[%s1693_s1 + $0xa8] sm:$0xff] (!%p115_p2)  }
   0xd   : > { %1237 = vmatpush3.bf16.msra.mxu1 %v1358_v7  ;;  %1174 = vmatprep.subr.bf16.mxu0 %v1359_v8  ;;  %s1696_s15 = smov (!%p138_p3, %s1080_s15), 63  ;;  %v1375_v24 = vld [vmem:[%s1693_s1 + $0x70] sm:$0xff]   ;;  %v1379_v28 = vld [vmem:[%s1693_s1 + $0x78] sm:$0xff]   ;;  %v1389_v36 = vld [vmem:[%s1693_s1 + $0x100] sm:$0xff]  }
   0xe   : > { %1238 = vmatprep.subr.bf16.mxu1 %v1360_v9  ;;  %v1376_v25 = vld [vmem:[%s1693_s1 + $0xf0] sm:$0xff]   ;;  %s1342_s11 = smul.u32 20, %s1696_s15  ;;  %v1380_v29 = vld [vmem:[%s1693_s1 + $0xf8] sm:$0xff]   ;;  %v1402_v42 = vld [vmem:[%s1693_s1 + $0x108] sm:$0xff]   ;;  %s1083_s7 = sshll.u32 %s1696_s15, 3 }
   0xf   : > { %v1377_v26 = vld [vmem:[%s1693_s1 + $0x30] sm:$0xff]   ;;  %v1381_v30 = vld [vmem:[%s1693_s1 + $0x38] sm:$0xff]   ;;  %s1662_s12 = scalar_lea.vmem %s1694_s2, %s1083_s7 }
  0x10   : > { %1175 = vmatpush3.bf16.msra.mxu0 %v1361_v10  ;;  %v1378_v27 = vld [vmem:[%s1693_s1 + $0xb0] sm:$0xff]   ;;  %s1572_s23 = scalar_lea.vmem %s1692_s0, %s1342_s11  ;;  %v1382_v31 = vld [vmem:[%s1693_s1 + $0xb8] sm:$0xff]  }
  0x11   : > { %1239 = vmatpush3.bf16.msra.mxu1 %v1362_v11  ;;  %1176 = vmatprep.subr.bf16.mxu0 %v1363_v12  ;;  %v1383_v32 = vld [vmem:[%s1572_s23] ss:$20 sps:$4 sm:$0xff]   ;;  %v1385_v33 = vld [vmem:[%s1572_s23 + $0x4] ss:$20 sps:$4 sm:$0xff]   ;;  %v1386_v34 = vld [vmem:[%s1572_s23 + $0x8] ss:$20 sps:$4 sm:$0xff]  }
  0x12   : > { %1240 = vmatprep.subr.bf16.mxu1 %v1364_v13  ;;  %v1388_v35 = vld [vmem:[%s1572_s23 + $0xc] ss:$20 sps:$4 sm:$0xff]   ;;  %744 = vmatprep.mubr.bf16.mxu0 %v1385_v33  ;;  %v1392_v38 = vld [vmem:[%s1572_s23 + $0x34] ss:$20 sps:$4 sm:$0xff]   ;;  %v1395_v40 = vld [vmem:[%s1572_s23 + $0x30] ss:$20 sps:$4 sm:$0xff]  }
  0x13   : > { %841 = vmatprep.mubr.bf16.mxu1 %v1388_v35  ;;  %v1390_v37 = vld [vmem:[%s1572_s23 + $0x2c] ss:$20 sps:$4 sm:$0xff]   ;;  %v1394_v39 = vld [vmem:[%s1572_s23 + $0x28] ss:$20 sps:$4 sm:$0xff]   ;;  %v1400_v44 = vld [vmem:[%s1572_s23 + $0x50] ss:$20 sps:$4 sm:$0xff]  }
  0x14   : > { %1177 = vmatpush3.bf16.msra.mxu0 %v1365_v14  ;;  %v1396_v41 = vld [vmem:[%s1572_s23 + $0x54] ss:$20 sps:$4 sm:$0xff]   ;;  %v1398_v43 = vld [vmem:[%s1572_s23 + $0x5c] ss:$20 sps:$4 sm:$0xff]   ;;  %v1401_v45 = vld [vmem:[%s1572_s23 + $0x58] ss:$20 sps:$4 sm:$0xff]  }
  0x15   : > { %1241 = vmatpush3.bf16.msra.mxu1 %v1366_v15  ;;  %1178 = vmatprep.subr.bf16.mxu0 %v1367_v16  ;;  %v1415_v46 = vld [vmem:[%s1693_s1 + $0x110] sm:$0xff]   ;;  %v1405_v48 = vld [vmem:[%s1572_s23 + $0x84] ss:$20 sps:$4 sm:$0xff]   ;;  %v1411_v53 = vld [vmem:[%s1572_s23 + $0xac] ss:$20 sps:$4 sm:$0xff]  }
  0x16   : > { %1242 = vmatprep.subr.bf16.mxu1 %v1368_v17  ;;  %v1403_v47 = vld [vmem:[%s1572_s23 + $0x7c] ss:$20 sps:$4 sm:$0xff]   ;;  %v1407_v50 = vld [vmem:[%s1572_s23 + $0x78] ss:$20 sps:$4 sm:$0xff]   ;;  %v1408_v51 = vld [vmem:[%s1572_s23 + $0x80] ss:$20 sps:$4 sm:$0xff]  }
  0x17   : > { %v1428_v49 = vld [vmem:[%s1693_s1 + $0x118] sm:$0xff]   ;;  %v1413_v54 = vld [vmem:[%s1572_s23 + $0xa0] ss:$20 sps:$4 sm:$0xff]   ;;  %v1421_v59 = vld [vmem:[%s1572_s23 + $0xd0] ss:$20 sps:$4 sm:$0xff]  }
  0x18   : > { %1179 = vmatpush3.bf16.msra.mxu0 %v1369_v18  ;;  %v1409_v52 = vld [vmem:[%s1572_s23 + $0xa4] ss:$20 sps:$4 sm:$0xff]   ;;  %v1414_v55 = vld [vmem:[%s1572_s23 + $0xa8] ss:$20 sps:$4 sm:$0xff]   ;;  %v1416_v56 = vld [vmem:[%s1572_s23 + $0xcc] ss:$20 sps:$4 sm:$0xff]  }
  0x19   : > { %1243 = vmatpush3.bf16.msra.mxu1 %v1370_v19  ;;  %1180 = vmatprep.subr.bf16.mxu0 %v1371_v20  ;;  %v1418_v57 = vld [vmem:[%s1572_s23 + $0xd4] ss:$20 sps:$4 sm:$0xff]   ;;  %v1424_v61 = vld [vmem:[%s1572_s23 + $0xfc] ss:$20 sps:$4 sm:$0xff]   ;;  %v1427_v63 = vld [vmem:[%s1572_s23 + $0xf8] ss:$20 sps:$4 sm:$0xff]  }
  0x1a   : > { %1244 = vmatprep.subr.bf16.mxu1 %v1372_v21  ;;  %v1420_v58 = vld [vmem:[%s1572_s23 + $0xc8] ss:$20 sps:$4 sm:$0xff]   ;;  %v1426_v62 = vld [vmem:[%s1572_s23 + $0xf0] ss:$20 sps:$4 sm:$0xff]   ;;  %v1433_v2 = vld [vmem:[%s1572_s23 + $0x118] ss:$20 sps:$4 sm:$0xff]  }
  0x1b   : > { %v1422_v60 = vld [vmem:[%s1572_s23 + $0xf4] ss:$20 sps:$4 sm:$0xff]   ;;  %v1429_v0 = vld [vmem:[%s1572_s23 + $0x11c] ss:$20 sps:$4 sm:$0xff]   ;;  %v1431_v1 = vld [vmem:[%s1572_s23 + $0x124] ss:$20 sps:$4 sm:$0xff]  }
  0x1c   : > { %1181 = vmatpush3.bf16.msra.mxu0 %v1373_v22  ;;  %v1434_v3 = vld [vmem:[%s1572_s23 + $0x120] ss:$20 sps:$4 sm:$0xff]   ;;  %v1435_v4 = vld [vmem:[%s1572_s23 + $0x10] ss:$20 sps:$4 sm:$0xff]   ;;  %v1437_v6 = vld [vmem:[%s1572_s23 + $0x38] ss:$20 sps:$4 sm:$0xff]  }
  0x1d   : > { %1245 = vmatpush3.bf16.msra.mxu1 %v1374_v23  ;;  %1182 = vmatprep.subr.bf16.mxu0 %v1375_v24  ;;  %v1436_v5 = vld [vmem:[%s1572_s23 + $0xb0] ss:$20 sps:$4 sm:$0xff]   ;;  %v1438_v7 = vld [vmem:[%s1572_s23 + $0xd8] ss:$20 sps:$4 sm:$0xff]   ;;  %v1439_v8 = vld [vmem:[%s1572_s23 + $0x60] ss:$20 sps:$4 sm:$0xff]  }
  0x1e   : > { %1246 = vmatprep.subr.bf16.mxu1 %v1376_v25  ;;  %v1440_v9 = vld [vmem:[%s1572_s23 + $0x100] ss:$20 sps:$4 sm:$0xff]   ;;  %v1441_v10 = vld [vmem:[%s1572_s23 + $0x88] ss:$20 sps:$4 sm:$0xff]  }
  0x1f   : > { %v1442_v11 = vld [vmem:[%s1572_s23 + $0x128] ss:$20 sps:$4 sm:$0xff]  }
  0x20   : > { %1183 = vmatpush3.bf16.msra.mxu0 %v1377_v26 }
  0x21   : > { %1247 = vmatpush3.bf16.msra.mxu1 %v1378_v27  ;;  %1184 = vmatprep.subr.bf16.mxu0 %v1379_v28 }
  0x22   : > { %1248 = vmatprep.subr.bf16.mxu1 %v1380_v29 }
  0x24   : > { %1185 = vmatpush3.bf16.msra.mxu0 %v1381_v30 }
  0x25   : > { %1249 = vmatpush3.bf16.msra.mxu1 %v1382_v31  ;;  %1310 = vmatprep.subr.bf16.mxu0 %v1389_v36 }
  0x26   : > { %1334 = vmatprep.subr.bf16.mxu1 %v1389_v36 }
  0x27   : > { %745 = vmatmul.mubr.bf16.vlgmr.msra.gmra.mrb[0].mxu0 %v1383_v32 }
  0x28   : > { %842 = vmatmul.mubr.bf16.vlgmr.msra.gmra.mrb[0].mxu1 %v1386_v34  ;;  %1311 = vmatpush3.bf16.msra.mxu0 %v1389_v36 }
  0x29   : > { %1338 = vmatpush3.bf16.msra.mxu1 %v1389_v36  ;;  %752 = vmatprep.mubr.bf16.mxu0 %v1390_v37 }
  0x2a   : > { %849 = vmatprep.mubr.bf16.mxu1 %v1392_v38  ;;  %1312 = vmatprep.subr.bf16.mxu0 %v1402_v42 }
  0x2b   : > { %1335 = vmatprep.subr.bf16.mxu1 %v1402_v42 }
  0x2c   : > { %1313 = vmatpush3.bf16.msra.mxu0 %v1402_v42 }
  0x2d   : > { %1339 = vmatpush3.bf16.msra.mxu1 %v1402_v42  ;;  %1314 = vmatprep.subr.bf16.mxu0 %v1415_v46 }
  0x2e   : > { %1336 = vmatprep.subr.bf16.mxu1 %v1415_v46 }
  0x2f   : > { %753 = vmatmul.mubr.bf16.gmra.mrb[4].mxu0 %v1394_v39 }
  0x30   : > { %850 = vmatmul.mubr.bf16.gmra.mrb[4].mxu1 %v1395_v40  ;;  %760 = vmatprep.mubr.bf16.mxu0 %v1396_v41 }
  0x31   : > { %857 = vmatprep.mubr.bf16.mxu1 %v1398_v43  ;;  %1315 = vmatpush3.bf16.msra.mxu0 %v1415_v46 }
  0x32   : > { %1340 = vmatpush3.bf16.msra.mxu1 %v1415_v46  ;;  %1316 = vmatprep.subr.bf16.mxu0 %v1428_v49 }
  0x33   : > { %1337 = vmatprep.subr.bf16.mxu1 %v1428_v49 }
  0x35   : > { %1317 = vmatpush3.bf16.msra.mxu0 %v1428_v49 }
  0x36   : > { %1341 = vmatpush3.bf16.msra.mxu1 %v1428_v49 }
  0x37   : > { %761 = vmatmul.mubr.bf16.gmra.mrb[8].mxu0 %v1400_v44 }
  0x38   : > { %858 = vmatmul.mubr.bf16.gmra.mrb[8].mxu1 %v1401_v45  ;;  %768 = vmatprep.mubr.bf16.mxu0 %v1403_v47 }
  0x39   : > { %865 = vmatprep.mubr.bf16.mxu1 %v1405_v48 }
  0x3f   : > { %769 = vmatmul.mubr.bf16.gmra.mrb[12].mxu0 %v1407_v50 }
  0x40   : > { %866 = vmatmul.mubr.bf16.gmra.mrb[12].mxu1 %v1408_v51  ;;  %776 = vmatprep.mubr.bf16.mxu0 %v1409_v52 }
  0x41   : > { %873 = vmatprep.mubr.bf16.mxu1 %v1411_v53 }
  0x47   : > { %777 = vmatmul.mubr.bf16.gmra.mrb[16].mxu0 %v1413_v54 }
  0x48   : > { %874 = vmatmul.mubr.bf16.gmra.mrb[16].mxu1 %v1414_v55  ;;  %784 = vmatprep.mubr.bf16.mxu0 %v1416_v56 }
  0x49   : > { %881 = vmatprep.mubr.bf16.mxu1 %v1418_v57 }
  0x4f   : > { %785 = vmatmul.mubr.bf16.gmra.mrb[20].mxu0 %v1420_v58 }
  0x50   : > { %882 = vmatmul.mubr.bf16.gmra.mrb[20].mxu1 %v1421_v59  ;;  %792 = vmatprep.mubr.bf16.mxu0 %v1422_v60 }
  0x51   : > { %889 = vmatprep.mubr.bf16.mxu1 %v1424_v61 }
  0x57   : > { %793 = vmatmul.mubr.bf16.gmra.mrb[24].mxu0 %v1426_v62 }
  0x58   : > { %890 = vmatmul.mubr.bf16.gmra.mrb[24].mxu1 %v1427_v63  ;;  %800 = vmatprep.mubr.bf16.mxu0 %v1429_v0 }
  0x59   : > { %897 = vmatprep.mubr.bf16.mxu1 %v1431_v1 }
  0x5f   : > { %801 = vmatmul.mubr.bf16.gmra.mrb[28].mxu0 %v1433_v2 }
  0x60   : > { %898 = vmatmul.mubr.bf16.gmra.mrb[28].mxu1 %v1434_v3  ;;  %1318 = vmatprep.mubr.msk.bf16.mxu0 %vm687_vm0, %v1435_v4 }
  0x61   : > { %1326 = vmatprep.mubr.msk.bf16.mxu1 %vm687_vm0, %v1436_v5 }
  0x67   : > { %1319 = vmatmul.mubr.msk.bf16.vlgmr.msra.gmra.mrb[32].mxu0 %vm687_vm0, %v1437_v6 }
  0x68   : > { %1327 = vmatmul.mubr.msk.bf16.vlgmr.msra.gmra.mrb[32].mxu1 %vm687_vm0, %v1438_v7  ;;  %1322 = vmatprep.mubr.msk.bf16.mxu0 %vm687_vm0, %v1439_v8 }
  0x69   : > { %1330 = vmatprep.mubr.msk.bf16.mxu1 %vm687_vm0, %v1440_v9 }
  0x6f   : > { %1323 = vmatmul.mubr.msk.bf16.gmra.mrb[36].mxu0 %vm687_vm0, %v1441_v10 }
  0x70   : > { %1331 = vmatmul.mubr.msk.bf16.gmra.mrb[36].mxu1 %vm687_vm0, %v1442_v11 }
  0xfa   : > { %v1186_v12 = vpop.f32.mrb[0].mxu0 }
  0xfb   : > { %v1250_v13 = vpop.f32.mrb[0].mxu1  ;;  %v1187_v14 = vpop.f32.mrb[1].mxu0 }
  0xfc   : > { %v1188_v15 = vadd.f32 %v1187_v14, %v1186_v12  ;;  %v1251_v16 = vpop.f32.mrb[1].mxu1  ;;  %v1189_v17 = vpop.f32.mrb[2].mxu0 }
  0xfd   : > { %v1252_v18 = vadd.f32 %v1251_v16, %v1250_v13  ;;  %v1253_v19 = vpop.f32.mrb[2].mxu1  ;;  %v1190_v20 = vpop.f32.mrb[3].mxu0 }
  0xfe   : > { %v1191_v21 = vadd.f32 %v1190_v20, %v1189_v17  ;;  %v1254_v22 = vpop.f32.mrb[3].mxu1 }
  0xff   : > { %v1255_v23 = vadd.f32 %v1254_v22, %v1253_v19  ;;  %v1640_v24 = vadd.f32 %v1252_v18, %v1188_v15 }
 0x101   : > { %v1642_v25 = vadd.f32 %v1255_v23, %v1191_v21 }
 0x102   : > { %v1192_v26 = vpop.f32.mrb[4].mxu0 }
 0x103   : > { %v1256_v27 = vpop.f32.mrb[4].mxu1  ;;  %v1193_v28 = vpop.f32.mrb[5].mxu0 }
 0x104   : > { %v1194_v29 = vadd.f32 %v1193_v28, %v1192_v26  ;;  %v1257_v30 = vpop.f32.mrb[5].mxu1  ;;  %v1195_v31 = vpop.f32.mrb[6].mxu0 }
 0x105   : > { %v1258_v32 = vadd.f32 %v1257_v30, %v1256_v27  ;;  %v1259_v33 = vpop.f32.mrb[6].mxu1  ;;  %v1196_v34 = vpop.f32.mrb[7].mxu0 }
 0x106   : > { %v1197_v35 = vadd.f32 %v1196_v34, %v1195_v31  ;;  %v1260_v36 = vpop.f32.mrb[7].mxu1 }
 0x107   : > { %v1261_v37 = vadd.f32 %v1260_v36, %v1259_v33  ;;  %v1644_v38 = vadd.f32 %v1258_v32, %v1194_v29 }
 0x109   : > { %v1646_v39 = vadd.f32 %v1261_v37, %v1197_v35 }
 0x10a   : > { %v1198_v40 = vpop.f32.mrb[8].mxu0 }
 0x10b   : > { %v1262_v41 = vpop.f32.mrb[8].mxu1  ;;  %v1199_v42 = vpop.f32.mrb[9].mxu0 }
 0x10c   : > { %v1200_v43 = vadd.f32 %v1199_v42, %v1198_v40  ;;  %v1263_v44 = vpop.f32.mrb[9].mxu1  ;;  %v1201_v45 = vpop.f32.mrb[10].mxu0 }
 0x10d   : > { %v1264_v46 = vadd.f32 %v1263_v44, %v1262_v41  ;;  %v1265_v47 = vpop.f32.mrb[10].mxu1  ;;  %v1202_v48 = vpop.f32.mrb[11].mxu0 }
 0x10e   : > { %v1203_v49 = vadd.f32 %v1202_v48, %v1201_v45  ;;  %v1266_v50 = vpop.f32.mrb[11].mxu1 }
 0x10f   : > { %v1267_v51 = vadd.f32 %v1266_v50, %v1265_v47  ;;  %v1648_v52 = vadd.f32 %v1264_v46, %v1200_v43 }
 0x111   : > { %v1650_v53 = vadd.f32 %v1267_v51, %v1203_v49 }
 0x112   : > { %v1204_v54 = vpop.f32.mrb[12].mxu0 }
 0x113   : > { %v1268_v55 = vpop.f32.mrb[12].mxu1  ;;  %v1205_v56 = vpop.f32.mrb[13].mxu0 }
 0x114   : > { %v1206_v57 = vadd.f32 %v1205_v56, %v1204_v54  ;;  %v1269_v58 = vpop.f32.mrb[13].mxu1  ;;  %v1207_v59 = vpop.f32.mrb[14].mxu0 }
 0x115   : > { %v1270_v60 = vadd.f32 %v1269_v58, %v1268_v55  ;;  %v1271_v61 = vpop.f32.mrb[14].mxu1  ;;  %v1208_v62 = vpop.f32.mrb[15].mxu0 }
 0x116   : > { %v1209_v63 = vadd.f32 %v1208_v62, %v1207_v59  ;;  %v1272_v0 = vpop.f32.mrb[15].mxu1 }
 0x117   : > { %v1273_v1 = vadd.f32 %v1272_v0, %v1271_v61  ;;  %v1652_v2 = vadd.f32 %v1270_v60, %v1206_v57 }
 0x119   : > { %v1654_v3 = vadd.f32 %v1273_v1, %v1209_v63 }
 0x11a   : > { %v1210_v4 = vpop.f32.mrb[16].mxu0 }
 0x11b   : > { %v1274_v5 = vpop.f32.mrb[16].mxu1  ;;  %v1211_v6 = vpop.f32.mrb[17].mxu0 }
 0x11c   : > { %v1212_v7 = vadd.f32 %v1211_v6, %v1210_v4  ;;  %v1275_v8 = vpop.f32.mrb[17].mxu1  ;;  %v1213_v9 = vpop.f32.mrb[18].mxu0 }
 0x11d   : > { %v1276_v10 = vadd.f32 %v1275_v8, %v1274_v5  ;;  %v1277_v11 = vpop.f32.mrb[18].mxu1  ;;  %v1214_v12 = vpop.f32.mrb[19].mxu0 }
 0x11e   : > { %v1215_v13 = vadd.f32 %v1214_v12, %v1213_v9  ;;  %v1278_v14 = vpop.f32.mrb[19].mxu1 }
 0x11f   : > { %v1279_v15 = vadd.f32 %v1278_v14, %v1277_v11  ;;  %v876_v16 = vadd.f32 %v1276_v10, %v1212_v7 }
 0x121   : > { %v1656_v17 = vadd.f32 %v1279_v15, %v1215_v13 }
 0x122   : > { %v1216_v18 = vpop.f32.mrb[20].mxu0 }
 0x123   : > { %v1280_v19 = vpop.f32.mrb[20].mxu1  ;;  %v1217_v20 = vpop.f32.mrb[21].mxu0 }
 0x124   : > { %v1218_v21 = vadd.f32 %v1217_v20, %v1216_v18  ;;  %v1281_v22 = vpop.f32.mrb[21].mxu1  ;;  %v1219_v23 = vpop.f32.mrb[22].mxu0 }
 0x125   : > { %v1282_v26 = vadd.f32 %v1281_v22, %v1280_v19  ;;  %v1283_v27 = vpop.f32.mrb[22].mxu1  ;;  %v1220_v28 = vpop.f32.mrb[23].mxu0 }
 0x126   : > { %v1221_v29 = vadd.f32 %v1220_v28, %v1219_v23  ;;  %v1284_v30 = vpop.f32.mrb[23].mxu1 }
 0x127   : > { %v1285_v31 = vadd.f32 %v1284_v30, %v1283_v27  ;;  %v884_v32 = vadd.f32 %v1282_v26, %v1218_v21 }
 0x129   : > { %v887_v33 = vadd.f32 %v1285_v31, %v1221_v29 }
 0x12a   : > { %v1222_v34 = vpop.f32.mrb[24].mxu0 }
 0x12b   : > { %v1286_v35 = vpop.f32.mrb[24].mxu1  ;;  %v1223_v36 = vpop.f32.mrb[25].mxu0 }
 0x12c   : > { %v1224_v37 = vadd.f32 %v1223_v36, %v1222_v34  ;;  %v1287_v40 = vpop.f32.mrb[25].mxu1  ;;  %v1225_v41 = vpop.f32.mrb[26].mxu0 }
 0x12d   : > { %v1288_v42 = vadd.f32 %v1287_v40, %v1286_v35  ;;  %v1289_v43 = vpop.f32.mrb[26].mxu1  ;;  %v1226_v44 = vpop.f32.mrb[27].mxu0 }
 0x12e   : > { %v1227_v45 = vadd.f32 %v1226_v44, %v1225_v41  ;;  %v1290_v46 = vpop.f32.mrb[27].mxu1 }
 0x12f   : > { %v1291_v47 = vadd.f32 %v1290_v46, %v1289_v43  ;;  %v892_v48 = vadd.f32 %v1288_v42, %v1224_v37 }
 0x131   : > { %v895_v49 = vadd.f32 %v1291_v47, %v1227_v45 }
 0x132   : > { %v1228_v50 = vpop.f32.mrb[28].mxu0 }
 0x133   : > { %v1292_v51 = vpop.f32.mrb[28].mxu1  ;;  %v1229_v54 = vpop.f32.mrb[29].mxu0 }
 0x134   : > { %v1230_v55 = vadd.f32 %v1229_v54, %v1228_v50  ;;  %v1293_v56 = vpop.f32.mrb[29].mxu1  ;;  %v1231_v57 = vpop.f32.mrb[30].mxu0 }
 0x135   : > { %v1294_v58 = vadd.f32 %v1293_v56, %v1292_v51  ;;  %v1295_v59 = vpop.f32.mrb[30].mxu1  ;;  %v1232_v60 = vpop.f32.mrb[31].mxu0 }
 0x136   : > { %v1233_v61 = vadd.f32 %v1232_v60, %v1231_v57  ;;  %v1296_v62 = vpop.f32.mrb[31].mxu1 }
 0x137   : > { %v1297_v63 = vadd.f32 %v1296_v62, %v1295_v59  ;;  %v900_v0 = vadd.f32 %v1294_v58, %v1230_v55 }
 0x139   : > { %v903_v1 = vadd.f32 %v1297_v63, %v1233_v61 }
 0x13a   : > { %v1320_v4 = vpop.f32.mrb[32].mxu0 }
 0x13b   : > { %v949_v5 = vadd.f32 %v1320_v4, %v1644_v38  ;;  %v1328_v6 = vpop.f32.mrb[32].mxu1  ;;  %v940_v7 = vpop.f32.mrb[33].mxu0 }
 0x13c   : > { %v981_v8 = vadd.f32 %v1328_v6, %v884_v32  ;;  %v941_v9 = vadd.f32 %v940_v7, %v1640_v24  ;;  %v972_v10 = vpop.f32.mrb[33].mxu1  ;;  %v1321_v11 = vpop.f32.mrb[34].mxu0 }
 0x13d   : > { %1005 = vst [vmem:[%s1662_s12 + $0x10] sm:$0xff] %v949_v5  ;;  %v973_v12 = vadd.f32 %v972_v10, %v876_v16  ;;  %v952_v13 = vadd.f32 %v1321_v11, %v1646_v39  ;;  %v1329_v14 = vpop.f32.mrb[34].mxu1  ;;  %v943_v15 = vpop.f32.mrb[35].mxu0 }
 0x13e   : > { %1013 = vst [vmem:[%s1662_s12 + $0x50] sm:$0xff] %v981_v8  ;;  %1003 = vst [vmem:[%s1662_s12] sm:$0xff] %v941_v9  ;;  %v984_v38 = vadd.f32 %v1329_v14, %v887_v33  ;;  %v944_v18 = vadd.f32 %v943_v15, %v1642_v25  ;;  %v975_v19 = vpop.f32.mrb[35].mxu1 }
 0x13f   : > { %1011 = vst [vmem:[%s1662_s12 + $0x40] sm:$0xff] %v973_v12  ;;  %1006 = vst [vmem:[%s1662_s12 + $0x18] sm:$0xff] %v952_v13  ;;  %v976_v24 = vadd.f32 %v975_v19, %v1656_v17 }
 0x140   : > { %1014 = vst [vmem:[%s1662_s12 + $0x58] sm:$0xff] %v984_v38  ;;  %1004 = vst [vmem:[%s1662_s12 + $0x8] sm:$0xff] %v944_v18 }
 0x141   : > { %1012 = vst [vmem:[%s1662_s12 + $0x48] sm:$0xff] %v976_v24 }
 0x142   : > { %v1324_v16 = vpop.f32.mrb[36].mxu0 }
 0x143   : > { %v965_v39 = vadd.f32 %v1324_v16, %v1652_v2  ;;  %v1332_v20 = vpop.f32.mrb[36].mxu1  ;;  %v956_v21 = vpop.f32.mrb[37].mxu0 }
 0x144   : > { %v997_v22 = vadd.f32 %v1332_v20, %v900_v0  ;;  %v957_v25 = vadd.f32 %v956_v21, %v1648_v52  ;;  %v988_v23 = vpop.f32.mrb[37].mxu1  ;;  %v1325_v26 = vpop.f32.mrb[38].mxu0 }
 0x145   : > { %1009 = vst [vmem:[%s1662_s12 + $0x30] sm:$0xff] %v965_v39  ;;  %v989_v17 = vadd.f32 %v988_v23, %v892_v48  ;;  %v968_v27 = vadd.f32 %v1325_v26, %v1654_v3  ;;  %v1333_v28 = vpop.f32.mrb[38].mxu1  ;;  %v959_v29 = vpop.f32.mrb[39].mxu0 }
 0x146   : > { %1017 = vst [vmem:[%s1662_s12 + $0x70] sm:$0xff] %v997_v22  ;;  %1007 = vst [vmem:[%s1662_s12 + $0x20] sm:$0xff] %v957_v25  ;;  %v1000_v2 = vadd.f32 %v1333_v28, %v903_v1  ;;  %v960_v30 = vadd.f32 %v959_v29, %v1650_v53  ;;  %v991_v31 = vpop.f32.mrb[39].mxu1 }
 0x147   : > { %1015 = vst [vmem:[%s1662_s12 + $0x60] sm:$0xff] %v989_v17  ;;  %1010 = vst [vmem:[%s1662_s12 + $0x38] sm:$0xff] %v968_v27  ;;  %v992_v52 = vadd.f32 %v991_v31, %v895_v49 }
 0x148   : > { %1018 = vst [vmem:[%s1662_s12 + $0x78] sm:$0xff] %v1000_v2  ;;  %1008 = vst [vmem:[%s1662_s12 + $0x28] sm:$0xff] %v960_v30 }
 0x149   : > { %1016 = vst [vmem:[%s1662_s12 + $0x68] sm:$0xff] %v992_v52 }
 0x14a PF: > { %s12_s9 = sadd.s32 1, %s1449_s9  }
 0x14b   : > { %p9_p4 = scmp.ge.s32.totalorder %s12_s9, 6  }
 0x14d   :  { %11 = sbr.rel (!%p9_p4) target bundleno = 1 (0x1), region = 58 }

</bundles_post_ra>
